<compile_context>
chip_gen: v7x
topology: tpu7x:2x2x1
jax: 0.10.0
libtpu: 0.0.40
codegen_flags: <defaults>
</compile_context>

<pallas_src>
import functools
import math

import jax
import jax.numpy as jnp
from jax.experimental import pallas as pl
from jax.experimental.pallas import tpu as pltpu

_LANE = 128
_SUBLANE = 8


def _round_up(x, m):
    return (x + m - 1) // m * m


def _cdiv(a, b):
    return -(-a // b)


def _vmem_limit_bytes():
    """Generation-aware scoped-VMEM request: 64 MiB on v5e/v6e (128 MiB
    physical), 32 MiB on v7x (64 MiB physical) or when the query fails."""
    try:
        cap = int(pltpu.get_tpu_info().vmem_capacity_bytes)
    except Exception:  # query unavailable (interpret mode / AOT on CPU)
        cap = 64 << 20
    return (64 << 20) if cap >= (96 << 20) else (32 << 20)


# -----------------------------------------------------------------------------
# Kernel 1: fused soft-attention read-out (both branches of compute_scores),
# gridded over the batch axis.
# -----------------------------------------------------------------------------
def _attn_pool(h_f, mask_f, pos_bf, w_a, w_b, w_v_row, glu_a_w, glu_a_b, glu_b_w):
    """One read-out branch.  h_f/mask_f in f32 (VPU), weights bf16 for the MXU,
    w_v_row / glu_a_b in f32 (VPU add / lane reduce)."""
    TB, L, D = h_f.shape
    h_bf = h_f.astype(jnp.bfloat16)

    # hs = sum_l(h * mask) / sum_l(mask)  -- VPU multiply + sublane (L) reduce.
    hs = jnp.sum(h_f * mask_f[:, :, None], axis=1)                    # [TB, D] f32
    cnt = jnp.maximum(jnp.sum(mask_f, axis=1, keepdims=True), 1e-6)   # all-zero guard
    hs = hs / cnt

    # nh = tanh(cat([pos, h], -1) @ w_1) == tanh(pos @ w_1[:D] + h @ w_1[D:])
    posw = jnp.dot(pos_bf, w_a, preferred_element_type=jnp.float32)   # [L, D]
    hw = jnp.dot(h_bf.reshape(TB * L, D), w_b,
                 preferred_element_type=jnp.float32).reshape(TB, L, D)
    nh = jnp.tanh(posw[None, :, :] + hw)                              # f32

    gate = (jnp.dot(nh.astype(jnp.bfloat16).reshape(TB * L, D), glu_a_w,
                    preferred_element_type=jnp.float32).reshape(TB, L, D)
            + glu_a_b[None, :, :]                                     # (1,1,D) bias
            + jnp.dot(hs.astype(jnp.bfloat16), glu_b_w,
                      preferred_element_type=jnp.float32)[:, None, :])
    g = jax.nn.sigmoid(gate)                                          # f32 [TB, L, D]

    # beta = g @ w_2  as a lane (feature) reduce -- avoids the N=1 MXU matmul.
    beta = jnp.sum(g * w_v_row[:, None, :], axis=-1)                  # [TB, L]
    beta = beta * mask_f

    # select = sum_l(beta * h)  -- VPU multiply + sublane reduce, f32 acc.
    return jnp.sum(beta[:, :, None] * h_f, axis=1)                    # [TB, D] f32


def readout_kernel(h_ref, gh_ref, mask_ref, pos_ref, tpos_ref,
                   w1a_ref, w1b_ref, w2_ref, glu1w_ref, glu1b_ref, glu2w_ref,
                   w3a_ref, w3b_ref, w4_ref, glu3w_ref, glu3b_ref, glu4w_ref,
                   sel_ref, tsel_ref, *, norm):
    mask_f = mask_ref[...]                                            # f32 [TB, L]

    select = _attn_pool(h_ref[...], mask_f, pos_ref[...],
                        w1a_ref[...], w1b_ref[...], w2_ref[...],
                        glu1w_ref[...], glu1b_ref[...], glu2w_ref[...])
    type_select = _attn_pool(gh_ref[...], mask_f, tpos_ref[...],
                             w3a_ref[...], w3b_ref[...], w4_ref[...],
                             glu3w_ref[...], glu3b_ref[...], glu4w_ref[...])

    if norm:  # static flag; rsqrt -> EUP.  eps guards zero / padded rows.
        select = select * jax.lax.rsqrt(
            jnp.sum(select * select, axis=1, keepdims=True) + 1e-12)
        type_select = type_select * jax.lax.rsqrt(
            jnp.sum(type_select * type_select, axis=1, keepdims=True) + 1e-12)

    # One full store per output block (no zero-init, no partial sub-stores).
    sel_ref[...] = select.astype(sel_ref.dtype)
    tsel_ref[...] = type_select.astype(tsel_ref.dtype)


# -----------------------------------------------------------------------------
# Kernel 2: N-tiled candidate matmul, two query slabs in, two score tiles out.
# -----------------------------------------------------------------------------
def scores_matmul_kernel(sq_ref, tq_ref, b_ref, s_ref, ts_ref, *, tau, scale):
    bt = b_ref[...]                                                   # [tile_n, D] bf16
    dims = (((1,), (1,)), ((), ()))
    s = jax.lax.dot_general(sq_ref[...], bt, dims, preferred_element_type=jnp.float32)
    t = jax.lax.dot_general(tq_ref[...], bt, dims, preferred_element_type=jnp.float32)
    if scale:  # static flag
        s = s * tau
        t = t * tau
    s_ref[...] = s
    ts_ref[...] = t


def _plan_n_tiling(n_items, d, q_rows):
    """Pick the candidate tile (multiple of 128 item rows) so the 2-deep bf16
    candidate stream plus the two double-buffered f32 output tiles fit ~60% of
    the scoped-VMEM request for the current chip generation.  Big tiles
    amortise the ~0.35us per-grid-step overhead (worst on v7x's 3.2 TB/s)."""
    budget = int(_vmem_limit_bytes() * 0.6)
    per_row = 2 * d * 2 + 2 * 2 * q_rows * 4      # b double-buffer + 2 f32 out tiles
    cap = max(_LANE, min(32768, (budget // per_row) // _LANE * _LANE))
    n_pad0 = _round_up(n_items, _LANE)
    grid = _cdiv(n_pad0, cap)
    tile = _round_up(_cdiv(n_pad0, grid), _LANE)
    return tile, tile * grid, grid


def prepare_candidates(params, *, norm, max_batch=32):
    """Candidate-table prep, hoisted out of compute_scores (run ONCE per weight
    update): L2-normalize, cast to bf16, pad the item axis to the planned tile
    multiple.  The feature axis is NOT padded (full-extent last dim is legal)."""
    b = params["embedding"][1:]
    n_items, d = b.shape
    if norm:
        b = b * jax.lax.rsqrt(jnp.sum(b * b, axis=1, keepdims=True) + 1e-12)
    q_rows = _round_up(max(int(max_batch), 1), _SUBLANE)
    tile_n, n_pad, grid_n = _plan_n_tiling(n_items, d, q_rows)
    b_p = jnp.pad(b.astype(jnp.bfloat16), ((0, n_pad - n_items), (0, 0)))
    return dict(table=b_p, n_items=n_items, tile_n=tile_n, grid_n=grid_n,
                max_batch_rows=q_rows)


# -----------------------------------------------------------------------------
# compute_scores wrapper
# -----------------------------------------------------------------------------
def compute_scores(params, hidden, global_hidden, mask, cand, *, norm, scale, tau):
    B, L, D = hidden.shape
    bf16 = jnp.bfloat16
    vmem_limit = _vmem_limit_bytes()

    # Batch tiling for the readout kernel: minimal padding to a multiple of 8,
    # largest tile in {32,16,8} that divides it ("parallel" => both TCs on v7x).
    B_pad = _round_up(B, _SUBLANE)
    TB = 8
    for t in (32, 16, 8):
        if B_pad % t == 0:
            TB = t
            break
    grid_b = B_pad // TB
    pad_b = B_pad - B

    h = jnp.pad(hidden.astype(jnp.float32), ((0, pad_b), (0, 0), (0, 0)))
    gh = jnp.pad(global_hidden.astype(jnp.float32), ((0, pad_b), (0, 0), (0, 0)))
    mask_f = jnp.pad(mask.astype(jnp.float32), ((0, pad_b), (0, 0)))

    # Weight prep (tiny): bf16 casts for MXU operands, pre-transpose torch
    # Linear weights ([out,in] -> [in,out]) so every matmul is x @ W.
    pos = params["pos_embedding"][:L].astype(bf16)
    tpos = params["type_pos_embedding"][:L].astype(bf16)
    w1a, w1b = params["w_1"][:D].astype(bf16), params["w_1"][D:].astype(bf16)
    w3a, w3b = params["w_3"][:D].astype(bf16), params["w_3"][D:].astype(bf16)
    w2 = params["w_2"].reshape(1, D)                 # f32 row: lane-reduce weight
    w4 = params["w_4"].reshape(1, D)
    glu1w = params["glu1_w"].T.astype(bf16)
    glu2w = params["glu2_w"].T.astype(bf16)
    glu3w = params["glu3_w"].T.astype(bf16)
    glu4w = params["glu4_w"].T.astype(bf16)
    glu1b = params["glu1_b"].reshape(1, D)           # f32 (added post-matmul)
    glu3b = params["glu3_b"].reshape(1, D)

    def w_spec(shape):
        nd = len(shape)
        return pl.BlockSpec(shape, lambda b, _n=nd: (0,) * _n)

    # ---- Kernel 1: batch-gridded fused attention read-out ----
    select_q, type_q = pl.pallas_call(
        functools.partial(readout_kernel, norm=norm),
        out_shape=(jax.ShapeDtypeStruct((B_pad, D), bf16),
                   jax.ShapeDtypeStruct((B_pad, D), bf16)),
        grid_spec=pltpu.PrefetchScalarGridSpec(
            num_scalar_prefetch=0,
            grid=(grid_b,),
            in_specs=[
                pl.BlockSpec((TB, L, D), lambda b: (b, 0, 0)),   # hidden
                pl.BlockSpec((TB, L, D), lambda b: (b, 0, 0)),   # global hidden
                pl.BlockSpec((TB, L), lambda b: (b, 0)),         # mask
                w_spec((L, D)), w_spec((L, D)),                  # pos, type_pos
                w_spec((D, D)), w_spec((D, D)), w_spec((1, D)),  # w1a, w1b, w2
                w_spec((D, D)), w_spec((1, D)), w_spec((D, D)),  # glu1w, glu1b, glu2w
                w_spec((D, D)), w_spec((D, D)), w_spec((1, D)),  # w3a, w3b, w4
                w_spec((D, D)), w_spec((1, D)), w_spec((D, D)),  # glu3w, glu3b, glu4w
            ],
            out_specs=(pl.BlockSpec((TB, D), lambda b: (b, 0)),
                       pl.BlockSpec((TB, D), lambda b: (b, 0)))),
        compiler_params=pltpu.CompilerParams(
            dimension_semantics=("parallel",),
            vmem_limit_bytes=vmem_limit),
    )(h, gh, mask_f, pos, tpos,
      w1a, w1b, w2, glu1w, glu1b, glu2w,
      w3a, w3b, w4, glu3w, glu3b, glu4w)

    # ---- Kernel 2: N-tiled candidate matmul on the precomputed bf16 table ----
    b_p = cand["table"]
    n_items, tile_n, grid_n = cand["n_items"], cand["tile_n"], cand["grid_n"]
    n_pad = b_p.shape[0]
    assert B_pad <= cand["max_batch_rows"], "batch exceeds prepared candidate plan"

    flops = 2 * 2 * B_pad * D * n_pad
    bytes_accessed = n_pad * D * 2 + 2 * B_pad * D * 2 + 2 * B_pad * n_pad * 4

    s_out, t_out = pl.pallas_call(
        functools.partial(scores_matmul_kernel, tau=float(tau), scale=scale),
        out_shape=(jax.ShapeDtypeStruct((B_pad, n_pad), jnp.float32),
                   jax.ShapeDtypeStruct((B_pad, n_pad), jnp.float32)),
        grid_spec=pltpu.PrefetchScalarGridSpec(
            num_scalar_prefetch=0,
            grid=(grid_n,),
            in_specs=[pl.BlockSpec((B_pad, D), lambda n: (0, 0)),    # select q (resident)
                      pl.BlockSpec((B_pad, D), lambda n: (0, 0)),    # type   q (resident)
                      pl.BlockSpec((tile_n, D), lambda n: (n, 0))],  # streamed candidates
            out_specs=(pl.BlockSpec((B_pad, tile_n), lambda n: (0, n)),
                       pl.BlockSpec((B_pad, tile_n), lambda n: (0, n)))),
        compiler_params=pltpu.CompilerParams(
            dimension_semantics=("parallel",),
            vmem_limit_bytes=vmem_limit),
        cost_estimate=pl.CostEstimate(flops=flops, transcendentals=0,
                                      bytes_accessed=bytes_accessed),
    )(select_q, type_q, b_p)

    if B_pad == B and n_pad == n_items:
        return s_out, t_out
    return s_out[:B, :n_items], t_out[:B, :n_items]


# -----------------------------------------------------------------------------
# forward(): embedding gathers / neighbor sampling are JAX glue.
# -----------------------------------------------------------------------------
def forward(params, adj_all, num, inputs, adj, mask_item, item, *, hop, sample_num):
    B, L = inputs.shape
    emb = params["embedding"]
    h = emb[inputs]                                           # [B, L, D]
    # TODO(synk): LocalAggregator source not provided; passthrough of item embeddings.
    hidden = h

    item_neighbors = [inputs]
    weight_neighbors = []
    support = L
    for _ in range(hop):
        flat = item_neighbors[-1].reshape(-1)
        sampled = adj_all[flat]
        sampled_w = num[flat]
        support *= sample_num
        item_neighbors.append(sampled.reshape(B, support))
        weight_neighbors.append(sampled_w.reshape(B, support))
    neighbor_hiddens = [emb[idx] for idx in item_neighbors]
    item_hidden = neighbor_hiddens[0]

    # sum_item_emb: plain XLA (a standalone pallas_call here is pure launch
    # overhead at these shapes; the result only feeds the passthrough below).
    mask_f = mask_item.astype(jnp.float32)
    item_emb = emb[item] * mask_f[:, :, None]
    denom = jnp.maximum(jnp.sum(mask_f, axis=1, keepdims=True), 1e-6)
    sum_item_emb = (jnp.sum(item_emb, axis=1) / denom)[:, None, :]
    sess_hiddens = [
        jnp.broadcast_to(sum_item_emb,
                         (B, neighbor_hiddens[i].shape[1], emb.shape[1]))
        for i in range(hop)
    ]
    # TODO(synk): GlobalContextExtractor source not provided; using hop-0 item
    # embeddings as the global hidden state (same [B, L, D] the scorer needs).
    _ = (neighbor_hiddens, weight_neighbors, sess_hiddens)
    global_hidden = item_hidden
    return hidden, global_hidden


# -----------------------------------------------------------------------------
# deterministic parameter init (uniform(-1/sqrt(dim), 1/sqrt(dim)), as in
# CombineGraph.reset_parameters)
# -----------------------------------------------------------------------------
def init_params(key, num_node, dim):
    stdv = 1.0 / math.sqrt(dim)
    shapes = {
        "embedding": (num_node, dim),
        "pos_embedding": (200, dim),
        "type_pos_embedding": (200, dim),
        "w_1": (2 * dim, dim),
        "w_2": (dim, 1),
        "glu1_w": (dim, dim),
        "glu1_b": (dim,),
        "glu2_w": (dim, dim),
        "w_3": (2 * dim, dim),
        "w_4": (dim, 1),
        "glu3_w": (dim, dim),
        "glu3_b": (dim,),
        "glu4_w": (dim, dim),
    }
    params = {}
    keys = jax.random.split(key, len(shapes))
    for k, (name, shp) in zip(keys, shapes.items()):
        params[name] = jax.random.uniform(k, shp, jnp.float32, -stdv, stdv)
    return params


if __name__ == "__main__":
    key = jax.random.PRNGKey(0)
    B, L, D = 2, 8, 32
    num_node = 40
    hop, sample_num = 2, 4
    tau, norm, scale = 12.0, True, True

    k_p, k_adj, k_num, k_in, k_item = jax.random.split(key, 5)
    params = init_params(k_p, num_node, D)
    adj_all = jax.random.randint(k_adj, (num_node, sample_num), 0, num_node,
                                 dtype=jnp.int32)
    num = jax.random.uniform(k_num, (num_node, sample_num), jnp.float32, 0.0, 1.0)

    inputs = jax.random.randint(k_in, (B, L), 1, num_node, dtype=jnp.int32)
    item = jax.random.randint(k_item, (B, L), 1, num_node, dtype=jnp.int32)
    adj = jnp.ones((B, L, L), jnp.float32)   # consumed only by LocalAggregator (TODO above)
    mask_item = jnp.concatenate(
        [jnp.ones((B, 6), jnp.int32), jnp.zeros((B, 2), jnp.int32)], axis=1)

    hidden, global_hidden = forward(params, adj_all, num, inputs, adj, mask_item,
                                    item, hop=hop, sample_num=sample_num)
    # Candidate-table prep hoisted: once per weight update, not per scoring call.
    cand = prepare_candidates(params, norm=norm, max_batch=B)
    scores, type_scores = compute_scores(params, hidden, global_hidden, mask_item,
                                         cand, norm=norm, scale=scale, tau=tau)

    jax.block_until_ready((hidden, global_hidden, scores, type_scores))
    assert hidden.shape == (B, L, D) and global_hidden.shape == (B, L, D)
    assert scores.shape == (B, num_node - 1)
    assert type_scores.shape == (B, num_node - 1)
    assert bool(jnp.all(jnp.isfinite(scores))) and bool(jnp.all(jnp.isfinite(type_scores)))
    print("KERNEL_OK")
</pallas_src>

<mosaic_0001>
module attributes {stable_mosaic.version = 11 : i64} {
  func.func @readout_kernel(%arg0: i32, %arg1: memref<8x8x32xf32, #tpu.memory_space<vmem>>, %arg2: memref<8x8x32xf32, #tpu.memory_space<vmem>>, %arg3: memref<8x8xf32, #tpu.memory_space<vmem>>, %arg4: memref<8x32xbf16, #tpu.memory_space<vmem>>, %arg5: memref<8x32xbf16, #tpu.memory_space<vmem>>, %arg6: memref<32x32xbf16, #tpu.memory_space<vmem>>, %arg7: memref<32x32xbf16, #tpu.memory_space<vmem>>, %arg8: memref<1x32xf32, #tpu.memory_space<vmem>>, %arg9: memref<32x32xbf16, #tpu.memory_space<vmem>>, %arg10: memref<1x32xf32, #tpu.memory_space<vmem>>, %arg11: memref<32x32xbf16, #tpu.memory_space<vmem>>, %arg12: memref<32x32xbf16, #tpu.memory_space<vmem>>, %arg13: memref<32x32xbf16, #tpu.memory_space<vmem>>, %arg14: memref<1x32xf32, #tpu.memory_space<vmem>>, %arg15: memref<32x32xbf16, #tpu.memory_space<vmem>>, %arg16: memref<1x32xf32, #tpu.memory_space<vmem>>, %arg17: memref<32x32xbf16, #tpu.memory_space<vmem>>, %arg18: memref<8x32xbf16, #tpu.memory_space<vmem>>, %arg19: memref<8x32xbf16, #tpu.memory_space<vmem>>) attributes {dimension_semantics = [#tpu.dimension_semantics<parallel>], iteration_bounds = array<i64: 1>, scalar_prefetch = 0 : i64, scratch_operands = 0 : i64, tpu.core_type = #tpu.core_type<tc>, window_params = [{transform_indices = @transform_0, window_bounds = array<i64: 8, 8, 32>}, {transform_indices = @transform_1, window_bounds = array<i64: 8, 8, 32>}, {transform_indices = @transform_2, window_bounds = array<i64: 8, 8>}, {pipeline_mode = #tpu.pipeline_mode<synchronous>, transform_indices = @transform_3, window_bounds = array<i64: 8, 32>}, {pipeline_mode = #tpu.pipeline_mode<synchronous>, transform_indices = @transform_4, window_bounds = array<i64: 8, 32>}, {pipeline_mode = #tpu.pipeline_mode<synchronous>, transform_indices = @transform_5, window_bounds = array<i64: 32, 32>}, {pipeline_mode = #tpu.pipeline_mode<synchronous>, transform_indices = @transform_6, window_bounds = array<i64: 32, 32>}, {pipeline_mode = #tpu.pipeline_mode<synchronous>, transform_indices = @transform_7, window_bounds = array<i64: 1, 32>}, {pipeline_mode = #tpu.pipeline_mode<synchronous>, transform_indices = @transform_8, window_bounds = array<i64: 32, 32>}, {pipeline_mode = #tpu.pipeline_mode<synchronous>, transform_indices = @transform_9, window_bounds = array<i64: 1, 32>}, {pipeline_mode = #tpu.pipeline_mode<synchronous>, transform_indices = @transform_10, window_bounds = array<i64: 32, 32>}, {pipeline_mode = #tpu.pipeline_mode<synchronous>, transform_indices = @transform_11, window_bounds = array<i64: 32, 32>}, {pipeline_mode = #tpu.pipeline_mode<synchronous>, transform_indices = @transform_12, window_bounds = array<i64: 32, 32>}, {pipeline_mode = #tpu.pipeline_mode<synchronous>, transform_indices = @transform_13, window_bounds = array<i64: 1, 32>}, {pipeline_mode = #tpu.pipeline_mode<synchronous>, transform_indices = @transform_14, window_bounds = array<i64: 32, 32>}, {pipeline_mode = #tpu.pipeline_mode<synchronous>, transform_indices = @transform_15, window_bounds = array<i64: 1, 32>}, {pipeline_mode = #tpu.pipeline_mode<synchronous>, transform_indices = @transform_16, window_bounds = array<i64: 32, 32>}, {transform_indices = @transform_17, window_bounds = array<i64: 8, 32>}, {transform_indices = @transform_18, window_bounds = array<i64: 8, 32>}]} {
    %c0 = arith.constant 0 : index
    %c0_0 = arith.constant 0 : index
    %0 = vector.load %arg3[%c0, %c0_0] : memref<8x8xf32, #tpu.memory_space<vmem>>, vector<8x8xf32>
    %c0_1 = arith.constant 0 : index
    %c0_2 = arith.constant 0 : index
    %c0_3 = arith.constant 0 : index
    %1 = vector.load %arg1[%c0_1, %c0_2, %c0_3] : memref<8x8x32xf32, #tpu.memory_space<vmem>>, vector<8x8x32xf32>
    %c0_4 = arith.constant 0 : index
    %c0_5 = arith.constant 0 : index
    %2 = vector.load %arg4[%c0_4, %c0_5] : memref<8x32xbf16, #tpu.memory_space<vmem>>, vector<8x32xbf16>
    %c0_6 = arith.constant 0 : index
    %c0_7 = arith.constant 0 : index
    %3 = vector.load %arg6[%c0_6, %c0_7] : memref<32x32xbf16, #tpu.memory_space<vmem>>, vector<32x32xbf16>
    %c0_8 = arith.constant 0 : index
    %c0_9 = arith.constant 0 : index
    %4 = vector.load %arg7[%c0_8, %c0_9] : memref<32x32xbf16, #tpu.memory_space<vmem>>, vector<32x32xbf16>
    %c0_10 = arith.constant 0 : index
    %c0_11 = arith.constant 0 : index
    %5 = vector.load %arg8[%c0_10, %c0_11] : memref<1x32xf32, #tpu.memory_space<vmem>>, vector<1x32xf32>
    %c0_12 = arith.constant 0 : index
    %c0_13 = arith.constant 0 : index
    %6 = vector.load %arg9[%c0_12, %c0_13] : memref<32x32xbf16, #tpu.memory_space<vmem>>, vector<32x32xbf16>
    %c0_14 = arith.constant 0 : index
    %c0_15 = arith.constant 0 : index
    %7 = vector.load %arg10[%c0_14, %c0_15] : memref<1x32xf32, #tpu.memory_space<vmem>>, vector<1x32xf32>
    %c0_16 = arith.constant 0 : index
    %c0_17 = arith.constant 0 : index
    %8 = vector.load %arg11[%c0_16, %c0_17] : memref<32x32xbf16, #tpu.memory_space<vmem>>, vector<32x32xbf16>
    %9 = arith.truncf %1 : vector<8x8x32xf32> to vector<8x8x32xbf16>
    %10 = vector.shape_cast %0 : vector<8x8xf32> to vector<8x8x1xf32>
    %11 = vector.broadcast %10 : vector<8x8x1xf32> to vector<8x8x32xf32>
    %12 = arith.mulf %1, %11 : vector<8x8x32xf32>
    %cst = arith.constant dense<0.000000e+00> : vector<8x32xf32>
    %13 = vector.multi_reduction <add>, %12, %cst [1] : vector<8x8x32xf32> to vector<8x32xf32>
    %cst_18 = arith.constant dense<0.000000e+00> : vector<8xf32>
    %14 = vector.multi_reduction <add>, %0, %cst_18 [1] : vector<8x8xf32> to vector<8xf32>
    %15 = vector.shape_cast %14 : vector<8xf32> to vector<8x1xf32>
    %cst_19 = arith.constant 9.99999997E-7 : f32
    %16 = vector.broadcast %cst_19 : f32 to vector<8x1xf32>
    %17 = arith.maximumf %15, %16 : vector<8x1xf32>
    %18 = vector.broadcast %17 : vector<8x1xf32> to vector<8x32xf32>
    %19 = arith.divf %13, %18 : vector<8x32xf32>
    %cst_20 = arith.constant dense<0.000000e+00> : vector<8x32xf32>
    %20 = tpu.matmul %2, %3, %cst_20 {dimension_numbers = #tpu.dot_dimension_numbers<[1], [0], [0], [1], [0, 0, 1, 1], [], []>} : vector<8x32xbf16>, vector<32x32xbf16>, vector<8x32xf32> -> vector<8x32xf32>
    %21 = vector.shape_cast %9 : vector<8x8x32xbf16> to vector<64x32xbf16>
    %cst_21 = arith.constant dense<0.000000e+00> : vector<64x32xf32>
    %22 = tpu.matmul %21, %4, %cst_21 {dimension_numbers = #tpu.dot_dimension_numbers<[1], [0], [0], [1], [0, 0, 1, 1], [], []>} : vector<64x32xbf16>, vector<32x32xbf16>, vector<64x32xf32> -> vector<64x32xf32>
    %23 = vector.shape_cast %22 : vector<64x32xf32> to vector<8x8x32xf32>
    %24 = vector.shape_cast %20 : vector<8x32xf32> to vector<1x8x32xf32>
    %25 = vector.broadcast %24 : vector<1x8x32xf32> to vector<8x8x32xf32>
    %26 = arith.addf %25, %23 : vector<8x8x32xf32>
    %27 = math.tanh %26 : vector<8x8x32xf32>
    %28 = arith.truncf %27 : vector<8x8x32xf32> to vector<8x8x32xbf16>
    %29 = vector.shape_cast %28 : vector<8x8x32xbf16> to vector<64x32xbf16>
    %cst_22 = arith.constant dense<0.000000e+00> : vector<64x32xf32>
    %30 = tpu.matmul %29, %6, %cst_22 {dimension_numbers = #tpu.dot_dimension_numbers<[1], [0], [0], [1], [0, 0, 1, 1], [], []>} : vector<64x32xbf16>, vector<32x32xbf16>, vector<64x32xf32> -> vector<64x32xf32>
    %31 = vector.shape_cast %30 : vector<64x32xf32> to vector<8x8x32xf32>
    %32 = vector.shape_cast %7 : vector<1x32xf32> to vector<1x1x32xf32>
    %33 = vector.broadcast %32 : vector<1x1x32xf32> to vector<8x8x32xf32>
    %34 = arith.addf %31, %33 : vector<8x8x32xf32>
    %35 = arith.truncf %19 : vector<8x32xf32> to vector<8x32xbf16>
    %cst_23 = arith.constant dense<0.000000e+00> : vector<8x32xf32>
    %36 = tpu.matmul %35, %8, %cst_23 {dimension_numbers = #tpu.dot_dimension_numbers<[1], [0], [0], [1], [0, 0, 1, 1], [], []>} : vector<8x32xbf16>, vector<32x32xbf16>, vector<8x32xf32> -> vector<8x32xf32>
    %37 = vector.shape_cast %36 : vector<8x32xf32> to vector<8x1x32xf32>
    %38 = vector.broadcast %37 : vector<8x1x32xf32> to vector<8x8x32xf32>
    %39 = arith.addf %34, %38 : vector<8x8x32xf32>
    %40 = arith.negf %39 : vector<8x8x32xf32>
    %41 = math.exp %40 : vector<8x8x32xf32>
    %cst_24 = arith.constant 1.000000e+00 : f32
    %42 = vector.broadcast %cst_24 : f32 to vector<8x8x32xf32>
    %43 = arith.addf %42, %41 : vector<8x8x32xf32>
    %44 = arith.divf %42, %43 : vector<8x8x32xf32>
    %45 = vector.shape_cast %5 : vector<1x32xf32> to vector<1x1x32xf32>
    %46 = vector.broadcast %45 : vector<1x1x32xf32> to vector<8x8x32xf32>
    %47 = arith.mulf %44, %46 : vector<8x8x32xf32>
    %cst_25 = arith.constant dense<0.000000e+00> : vector<8x8xf32>
    %48 = vector.multi_reduction <add>, %47, %cst_25 [2] : vector<8x8x32xf32> to vector<8x8xf32>
    %49 = arith.mulf %48, %0 : vector<8x8xf32>
    %50 = vector.shape_cast %49 : vector<8x8xf32> to vector<8x8x1xf32>
    %51 = vector.broadcast %50 : vector<8x8x1xf32> to vector<8x8x32xf32>
    %52 = arith.mulf %51, %1 : vector<8x8x32xf32>
    %cst_26 = arith.constant dense<0.000000e+00> : vector<8x32xf32>
    %53 = vector.multi_reduction <add>, %52, %cst_26 [1] : vector<8x8x32xf32> to vector<8x32xf32>
    %c0_27 = arith.constant 0 : index
    %c0_28 = arith.constant 0 : index
    %c0_29 = arith.constant 0 : index
    %54 = vector.load %arg2[%c0_27, %c0_28, %c0_29] : memref<8x8x32xf32, #tpu.memory_space<vmem>>, vector<8x8x32xf32>
    %c0_30 = arith.constant 0 : index
    %c0_31 = arith.constant 0 : index
    %55 = vector.load %arg5[%c0_30, %c0_31] : memref<8x32xbf16, #tpu.memory_space<vmem>>, vector<8x32xbf16>
    %c0_32 = arith.constant 0 : index
    %c0_33 = arith.constant 0 : index
    %56 = vector.load %arg12[%c0_32, %c0_33] : memref<32x32xbf16, #tpu.memory_space<vmem>>, vector<32x32xbf16>
    %c0_34 = arith.constant 0 : index
    %c0_35 = arith.constant 0 : index
    %57 = vector.load %arg13[%c0_34, %c0_35] : memref<32x32xbf16, #tpu.memory_space<vmem>>, vector<32x32xbf16>
    %c0_36 = arith.constant 0 : index
    %c0_37 = arith.constant 0 : index
    %58 = vector.load %arg14[%c0_36, %c0_37] : memref<1x32xf32, #tpu.memory_space<vmem>>, vector<1x32xf32>
    %c0_38 = arith.constant 0 : index
    %c0_39 = arith.constant 0 : index
    %59 = vector.load %arg15[%c0_38, %c0_39] : memref<32x32xbf16, #tpu.memory_space<vmem>>, vector<32x32xbf16>
    %c0_40 = arith.constant 0 : index
    %c0_41 = arith.constant 0 : index
    %60 = vector.load %arg16[%c0_40, %c0_41] : memref<1x32xf32, #tpu.memory_space<vmem>>, vector<1x32xf32>
    %c0_42 = arith.constant 0 : index
    %c0_43 = arith.constant 0 : index
    %61 = vector.load %arg17[%c0_42, %c0_43] : memref<32x32xbf16, #tpu.memory_space<vmem>>, vector<32x32xbf16>
    %62 = arith.truncf %54 : vector<8x8x32xf32> to vector<8x8x32xbf16>
    %63 = vector.shape_cast %0 : vector<8x8xf32> to vector<8x8x1xf32>
    %64 = vector.broadcast %63 : vector<8x8x1xf32> to vector<8x8x32xf32>
    %65 = arith.mulf %54, %64 : vector<8x8x32xf32>
    %cst_44 = arith.constant dense<0.000000e+00> : vector<8x32xf32>
    %66 = vector.multi_reduction <add>, %65, %cst_44 [1] : vector<8x8x32xf32> to vector<8x32xf32>
    %cst_45 = arith.constant dense<0.000000e+00> : vector<8xf32>
    %67 = vector.multi_reduction <add>, %0, %cst_45 [1] : vector<8x8xf32> to vector<8xf32>
    %68 = vector.shape_cast %67 : vector<8xf32> to vector<8x1xf32>
    %cst_46 = arith.constant 9.99999997E-7 : f32
    %69 = vector.broadcast %cst_46 : f32 to vector<8x1xf32>
    %70 = arith.maximumf %68, %69 : vector<8x1xf32>
    %71 = vector.broadcast %70 : vector<8x1xf32> to vector<8x32xf32>
    %72 = arith.divf %66, %71 : vector<8x32xf32>
    %cst_47 = arith.constant dense<0.000000e+00> : vector<8x32xf32>
    %73 = tpu.matmul %55, %56, %cst_47 {dimension_numbers = #tpu.dot_dimension_numbers<[1], [0], [0], [1], [0, 0, 1, 1], [], []>} : vector<8x32xbf16>, vector<32x32xbf16>, vector<8x32xf32> -> vector<8x32xf32>
    %74 = vector.shape_cast %62 : vector<8x8x32xbf16> to vector<64x32xbf16>
    %cst_48 = arith.constant dense<0.000000e+00> : vector<64x32xf32>
    %75 = tpu.matmul %74, %57, %cst_48 {dimension_numbers = #tpu.dot_dimension_numbers<[1], [0], [0], [1], [0, 0, 1, 1], [], []>} : vector<64x32xbf16>, vector<32x32xbf16>, vector<64x32xf32> -> vector<64x32xf32>
    %76 = vector.shape_cast %75 : vector<64x32xf32> to vector<8x8x32xf32>
    %77 = vector.shape_cast %73 : vector<8x32xf32> to vector<1x8x32xf32>
    %78 = vector.broadcast %77 : vector<1x8x32xf32> to vector<8x8x32xf32>
    %79 = arith.addf %78, %76 : vector<8x8x32xf32>
    %80 = math.tanh %79 : vector<8x8x32xf32>
    %81 = arith.truncf %80 : vector<8x8x32xf32> to vector<8x8x32xbf16>
    %82 = vector.shape_cast %81 : vector<8x8x32xbf16> to vector<64x32xbf16>
    %cst_49 = arith.constant dense<0.000000e+00> : vector<64x32xf32>
    %83 = tpu.matmul %82, %59, %cst_49 {dimension_numbers = #tpu.dot_dimension_numbers<[1], [0], [0], [1], [0, 0, 1, 1], [], []>} : vector<64x32xbf16>, vector<32x32xbf16>, vector<64x32xf32> -> vector<64x32xf32>
    %84 = vector.shape_cast %83 : vector<64x32xf32> to vector<8x8x32xf32>
    %85 = vector.shape_cast %60 : vector<1x32xf32> to vector<1x1x32xf32>
    %86 = vector.broadcast %85 : vector<1x1x32xf32> to vector<8x8x32xf32>
    %87 = arith.addf %84, %86 : vector<8x8x32xf32>
    %88 = arith.truncf %72 : vector<8x32xf32> to vector<8x32xbf16>
    %cst_50 = arith.constant dense<0.000000e+00> : vector<8x32xf32>
    %89 = tpu.matmul %88, %61, %cst_50 {dimension_numbers = #tpu.dot_dimension_numbers<[1], [0], [0], [1], [0, 0, 1, 1], [], []>} : vector<8x32xbf16>, vector<32x32xbf16>, vector<8x32xf32> -> vector<8x32xf32>
    %90 = vector.shape_cast %89 : vector<8x32xf32> to vector<8x1x32xf32>
    %91 = vector.broadcast %90 : vector<8x1x32xf32> to vector<8x8x32xf32>
    %92 = arith.addf %87, %91 : vector<8x8x32xf32>
    %93 = arith.negf %92 : vector<8x8x32xf32>
    %94 = math.exp %93 : vector<8x8x32xf32>
    %cst_51 = arith.constant 1.000000e+00 : f32
    %95 = vector.broadcast %cst_51 : f32 to vector<8x8x32xf32>
    %96 = arith.addf %95, %94 : vector<8x8x32xf32>
    %97 = arith.divf %95, %96 : vector<8x8x32xf32>
    %98 = vector.shape_cast %58 : vector<1x32xf32> to vector<1x1x32xf32>
    %99 = vector.broadcast %98 : vector<1x1x32xf32> to vector<8x8x32xf32>
    %100 = arith.mulf %97, %99 : vector<8x8x32xf32>
    %cst_52 = arith.constant dense<0.000000e+00> : vector<8x8xf32>
    %101 = vector.multi_reduction <add>, %100, %cst_52 [2] : vector<8x8x32xf32> to vector<8x8xf32>
    %102 = arith.mulf %101, %0 : vector<8x8xf32>
    %103 = vector.shape_cast %102 : vector<8x8xf32> to vector<8x8x1xf32>
    %104 = vector.broadcast %103 : vector<8x8x1xf32> to vector<8x8x32xf32>
    %105 = arith.mulf %104, %54 : vector<8x8x32xf32>
    %cst_53 = arith.constant dense<0.000000e+00> : vector<8x32xf32>
    %106 = vector.multi_reduction <add>, %105, %cst_53 [1] : vector<8x8x32xf32> to vector<8x32xf32>
    %107 = arith.mulf %53, %53 : vector<8x32xf32>
    %cst_54 = arith.constant dense<0.000000e+00> : vector<8xf32>
    %108 = vector.multi_reduction <add>, %107, %cst_54 [1] : vector<8x32xf32> to vector<8xf32>
    %109 = vector.shape_cast %108 : vector<8xf32> to vector<8x1xf32>
    %cst_55 = arith.constant 9.99999996E-13 : f32
    %110 = vector.broadcast %cst_55 : f32 to vector<8x1xf32>
    %111 = arith.addf %109, %110 : vector<8x1xf32>
    %112 = math.rsqrt %111 : vector<8x1xf32>
    %113 = vector.broadcast %112 : vector<8x1xf32> to vector<8x32xf32>
    %114 = arith.mulf %53, %113 : vector<8x32xf32>
    %115 = arith.mulf %106, %106 : vector<8x32xf32>
    %cst_56 = arith.constant dense<0.000000e+00> : vector<8xf32>
    %116 = vector.multi_reduction <add>, %115, %cst_56 [1] : vector<8x32xf32> to vector<8xf32>
    %117 = vector.shape_cast %116 : vector<8xf32> to vector<8x1xf32>
    %cst_57 = arith.constant 9.99999996E-13 : f32
    %118 = vector.broadcast %cst_57 : f32 to vector<8x1xf32>
    %119 = arith.addf %117, %118 : vector<8x1xf32>
    %120 = math.rsqrt %119 : vector<8x1xf32>
    %121 = vector.broadcast %120 : vector<8x1xf32> to vector<8x32xf32>
    %122 = arith.mulf %106, %121 : vector<8x32xf32>
    %123 = arith.truncf %114 : vector<8x32xf32> to vector<8x32xbf16>
    %c0_58 = arith.constant 0 : index
    %c0_59 = arith.constant 0 : index
    %124 = vector.load %arg18[%c0_58, %c0_59] : memref<8x32xbf16, #tpu.memory_space<vmem>>, vector<8x32xbf16>
    tpu.vector_store %arg18[%c0_58, %c0_59], %123 {strides = array<i32>} : memref<8x32xbf16, #tpu.memory_space<vmem>>, vector<8x32xbf16>,
    %125 = arith.truncf %122 : vector<8x32xf32> to vector<8x32xbf16>
    %c0_60 = arith.constant 0 : index
    %c0_61 = arith.constant 0 : index
    %126 = vector.load %arg19[%c0_60, %c0_61] : memref<8x32xbf16, #tpu.memory_space<vmem>>, vector<8x32xbf16>
    tpu.vector_store %arg19[%c0_60, %c0_61], %125 {strides = array<i32>} : memref<8x32xbf16, #tpu.memory_space<vmem>>, vector<8x32xbf16>,
    return
  }
  func.func @transform_0(%arg0: i32) -> (i32, i32, i32) {
    %c0_i32 = arith.constant 0 : i32
    %c0_i32_0 = arith.constant 0 : i32
    %c0_i32_1 = arith.constant 0 : i32
    return %arg0, %c0_i32, %c0_i32_0 : i32, i32, i32
  }
  func.func @transform_1(%arg0: i32) -> (i32, i32, i32) {
    %c0_i32 = arith.constant 0 : i32
    %c0_i32_0 = arith.constant 0 : i32
    %c0_i32_1 = arith.constant 0 : i32
    return %arg0, %c0_i32, %c0_i32_0 : i32, i32, i32
  }
  func.func @transform_2(%arg0: i32) -> (i32, i32) {
    %c0_i32 = arith.constant 0 : i32
    %c0_i32_0 = arith.constant 0 : i32
    return %arg0, %c0_i32 : i32, i32
  }
  func.func @transform_3(%arg0: i32) -> (i32, i32) {
    %c0_i32 = arith.constant 0 : i32
    %c0_i32_0 = arith.constant 0 : i32
    %c0_i32_1 = arith.constant 0 : i32
    return %c0_i32, %c0_i32_0 : i32, i32
  }
  func.func @transform_4(%arg0: i32) -> (i32, i32) {
    %c0_i32 = arith.constant 0 : i32
    %c0_i32_0 = arith.constant 0 : i32
    %c0_i32_1 = arith.constant 0 : i32
    return %c0_i32, %c0_i32_0 : i32, i32
  }
  func.func @transform_5(%arg0: i32) -> (i32, i32) {
    %c0_i32 = arith.constant 0 : i32
    %c0_i32_0 = arith.constant 0 : i32
    %c0_i32_1 = arith.constant 0 : i32
    return %c0_i32, %c0_i32_0 : i32, i32
  }
  func.func @transform_6(%arg0: i32) -> (i32, i32) {
    %c0_i32 = arith.constant 0 : i32
    %c0_i32_0 = arith.constant 0 : i32
    %c0_i32_1 = arith.constant 0 : i32
    return %c0_i32, %c0_i32_0 : i32, i32
  }
  func.func @transform_7(%arg0: i32) -> (i32, i32) {
    %c0_i32 = arith.constant 0 : i32
    %c0_i32_0 = arith.constant 0 : i32
    %c0_i32_1 = arith.constant 0 : i32
    return %c0_i32, %c0_i32_0 : i32, i32
  }
  func.func @transform_8(%arg0: i32) -> (i32, i32) {
    %c0_i32 = arith.constant 0 : i32
    %c0_i32_0 = arith.constant 0 : i32
    %c0_i32_1 = arith.constant 0 : i32
    return %c0_i32, %c0_i32_0 : i32, i32
  }
  func.func @transform_9(%arg0: i32) -> (i32, i32) {
    %c0_i32 = arith.constant 0 : i32
    %c0_i32_0 = arith.constant 0 : i32
    %c0_i32_1 = arith.constant 0 : i32
    return %c0_i32, %c0_i32_0 : i32, i32
  }
  func.func @transform_10(%arg0: i32) -> (i32, i32) {
    %c0_i32 = arith.constant 0 : i32
    %c0_i32_0 = arith.constant 0 : i32
    %c0_i32_1 = arith.constant 0 : i32
    return %c0_i32, %c0_i32_0 : i32, i32
  }
  func.func @transform_11(%arg0: i32) -> (i32, i32) {
    %c0_i32 = arith.constant 0 : i32
    %c0_i32_0 = arith.constant 0 : i32
    %c0_i32_1 = arith.constant 0 : i32
    return %c0_i32, %c0_i32_0 : i32, i32
  }
  func.func @transform_12(%arg0: i32) -> (i32, i32) {
    %c0_i32 = arith.constant 0 : i32
    %c0_i32_0 = arith.constant 0 : i32
    %c0_i32_1 = arith.constant 0 : i32
    return %c0_i32, %c0_i32_0 : i32, i32
  }
  func.func @transform_13(%arg0: i32) -> (i32, i32) {
    %c0_i32 = arith.constant 0 : i32
    %c0_i32_0 = arith.constant 0 : i32
    %c0_i32_1 = arith.constant 0 : i32
    return %c0_i32, %c0_i32_0 : i32, i32
  }
  func.func @transform_14(%arg0: i32) -> (i32, i32) {
    %c0_i32 = arith.constant 0 : i32
    %c0_i32_0 = arith.constant 0 : i32
    %c0_i32_1 = arith.constant 0 : i32
    return %c0_i32, %c0_i32_0 : i32, i32
  }
  func.func @transform_15(%arg0: i32) -> (i32, i32) {
    %c0_i32 = arith.constant 0 : i32
    %c0_i32_0 = arith.constant 0 : i32
    %c0_i32_1 = arith.constant 0 : i32
    return %c0_i32, %c0_i32_0 : i32, i32
  }
  func.func @transform_16(%arg0: i32) -> (i32, i32) {
    %c0_i32 = arith.constant 0 : i32
    %c0_i32_0 = arith.constant 0 : i32
    %c0_i32_1 = arith.constant 0 : i32
    return %c0_i32, %c0_i32_0 : i32, i32
  }
  func.func @transform_17(%arg0: i32) -> (i32, i32) {
    %c0_i32 = arith.constant 0 : i32
    %c0_i32_0 = arith.constant 0 : i32
    return %arg0, %c0_i32 : i32, i32
  }
  func.func @transform_18(%arg0: i32) -> (i32, i32) {
    %c0_i32 = arith.constant 0 : i32
    %c0_i32_0 = arith.constant 0 : i32
    return %arg0, %c0_i32 : i32, i32
  }
}

</mosaic_0001>

<bundles_post_ra>
// kernel: tpu_custom_call.1
= control target key start
LH: loop header
LB: loop body
LE: loop exit
PB: predicated region body
PF: predicated region fallthrough
CT: control target
= control target key end

     0   :  { %s3729_s0 = inlined_call_operand.hbm [shape: f32[8,8,32], index: 0, kind: input, shape index: {}]   ;;  %s3730_s1 = inlined_call_operand.hbm [shape: f32[8,8,32], index: 1, kind: input, shape index: {}]   ;;  %s3731_s2 = inlined_call_operand.hbm [shape: f32[8,8], index: 2, kind: input, shape index: {}]   ;;  %s3732_s3 = inlined_call_operand.hbm [shape: bf16[8,32], index: 3, kind: input, shape index: {}]   ;;  %s3733_s4 = inlined_call_operand.hbm [shape: bf16[8,32], index: 4, kind: input, shape index: {}]   ;;  %s3734_s5 = inlined_call_operand.vmem [shape: bf16[32,32], index: 5, kind: input, shape index: {}]   ;;  %s3735_s6 = inlined_call_operand.hbm [shape: bf16[32,32], index: 6, kind: input, shape index: {}]   ;;  %s3736_s7 = inlined_call_operand.vmem [shape: f32[1,32], index: 7, kind: input, shape index: {}]   ;;  %s3737_s8 = inlined_call_operand.hbm [shape: bf16[32,32], index: 8, kind: input, shape index: {}]   ;;  %s3738_s9 = inlined_call_operand.hbm [shape: f32[1,32], index: 9, kind: input, shape index: {}]   ;;  %s3739_s10 = inlined_call_operand.vmem [shape: bf16[32,32], index: 10, kind: input, shape index: {}]   ;;  %s3740_s11 = inlined_call_operand.hbm [shape: bf16[32,32], index: 11, kind: input, shape index: {}]   ;;  %s3741_s12 = inlined_call_operand.hbm [shape: bf16[32,32], index: 12, kind: input, shape index: {}]   ;;  %s3742_s13 = inlined_call_operand.hbm [shape: f32[1,32], index: 13, kind: input, shape index: {}]   ;;  %s3743_s14 = inlined_call_operand.vmem [shape: bf16[32,32], index: 14, kind: input, shape index: {}]   ;;  %s3744_s15 = inlined_call_operand.vmem [shape: f32[1,32], index: 15, kind: input, shape index: {}]   ;;  %s3745_s16 = inlined_call_operand.hbm [shape: bf16[32,32], index: 16, kind: input, shape index: {}]   ;;  %s3746_s17 = inlined_call_operand.hbm [shape: bf16[8,32], index: 17, kind: output, shape index: {0}]   ;;  %s3747_s18 = inlined_call_operand.hbm [shape: bf16[8,32], index: 18, kind: output, shape index: {1}]  }
   0x1   :  { %3753 = sst [smem:[#allocation34_spill]] %s3729_s0 }
   0x2   :  { %3754 = sst [smem:[#allocation35_spill]] %s3730_s1 }
   0x3   :  { %3755 = sst [smem:[#allocation36_spill]] %s3731_s2 }
   0x4   :  { %24 = vsyncpa [#allocation3], 0 }
   0x5   :  { %25 = vsyncpa [#allocation6], 0 }
   0x6   :  { %26 = vsyncpa [#allocation9], 0 }
   0x7   :  { %27 = vsyncpa [#allocation12], 0 }
   0x8   :  { %28 = vsyncpa [#allocation15], 0 }
   0x9   :  { %29 = vsyncpa [#allocation18], 0 }
   0xa   :  { %30 = vsyncpa [#allocation21], 0 }
   0xb   :  { %31 = vsyncpa [#allocation4], 0 }
   0xc   :  { %32 = vsyncpa [#allocation24], 0  ;;  %s2979_s27 = smov [#allocation5]   ;;  %s2980_s29 = smov [#allocation8]  }
   0xd   :  { %s50_s28 = sshll.u32 %s2979_s27, 4  ;;  %s73_s30 = sshll.u32 %s2980_s29, 4  ;;  %s51_s28 = int_to_ptr.vmem [resolvable:$true] %s50_s28  ;;  %s74_s30 = int_to_ptr.vmem [resolvable:$true] %s73_s30 }
   0xe   :  { %s3756_s1 = sld [smem:[#allocation35_spill]] }
  0x14   :  { %s2653_s20 = scalar_lea.hbm %s3756_s1, 1024 }
  0x15   :  { %p2654_p0 = scmp.ne.s32.totalorder %s3756_s1, %s2653_s20  ;;  %p2657_p1 = scmp.lt.u32.totalorder %s2653_s20, %s3756_s1 }
  0x17   :  { %p2659_p2 = pnand %p2657_p1, %p2654_p0 }
  0x19   :  { %2662 = shalt.err (!%p2659_p2)
}
  0x1a   :  { %s2663_s24 = scalar_lea.vmem %s51_s28, 1024  ;;  %p2668_p4 = scmp.lt.s32.totalorder %s51_s28, %s51_s28 }
  0x1b   :  { %p2664_p3 = scmp.ne.s32.totalorder %s51_s28, %s2663_s24  ;;  %p2669_p5 = scmp.lt.s32.totalorder %s2663_s24, %s2663_s24 }
  0x1d   :  { %p2670_p6 = por %p2669_p5, %p2668_p4 }
  0x1f   :  { %p2671_p7 = pnand %p2670_p6, %p2664_p3 }
  0x21   :  { %2674 = shalt.err (!%p2671_p7)
}
  0x22   :  { %s3751_s25 = smov 128   ;;  %s3752_s26 = smov 8  }
  0x23   :  { %56 = dma.hbm_to_vmem [thread:$0]  %s3756_s1, 1024, %s51_s28, [#allocation6], %s3751_s25, %s3751_s25, %s3752_s26  }
  0x24   :  { %s2675_s20 = scalar_lea.hbm %s3732_s3, 64 }
  0x25   :  { %p2676_p8 = scmp.ne.s32.totalorder %s3732_s3, %s2675_s20  ;;  %p2679_p9 = scmp.lt.u32.totalorder %s2675_s20, %s3732_s3 }
  0x27   :  { %p2681_p10 = pnand %p2679_p9, %p2676_p8 }
  0x29   :  { %2684 = shalt.err (!%p2681_p10)
}
  0x2a   :  { %s2685_s24 = scalar_lea.vmem %s74_s30, 64  ;;  %p2690_p12 = scmp.lt.s32.totalorder %s74_s30, %s74_s30 }
  0x2b   :  { %p2686_p11 = scmp.ne.s32.totalorder %s74_s30, %s2685_s24  ;;  %p2691_p13 = scmp.lt.s32.totalorder %s2685_s24, %s2685_s24 }
  0x2d   :  { %p2692_p0 = por %p2691_p13, %p2690_p12 }
  0x2f   :  { %p2693_p1 = pnand %p2692_p0, %p2686_p11 }
  0x31   :  { %2696 = shalt.err (!%p2693_p1)
}
  0x32   :  { %76 = dma.hbm_to_vmem [thread:$0]  %s3732_s3, 64, %s74_s30, [#allocation9]  }
  0x33   :  { %s2983_s27 = smov [#allocation11]   ;;  %s2697_s20 = scalar_lea.hbm %s3735_s6, 256 }
  0x34   :  { %s94_s29 = sshll.u32 %s2983_s27, 4  ;;  %p2698_p2 = scmp.ne.s32.totalorder %s3735_s6, %s2697_s20  ;;  %s95_s29 = int_to_ptr.vmem [resolvable:$true] %s94_s29 }
  0x35   :  { %p2701_p3 = scmp.lt.u32.totalorder %s2697_s20, %s3735_s6 }
  0x37   :  { %p2703_p4 = pnand %p2701_p3, %p2698_p2 }
  0x39   :  { %2706 = shalt.err (!%p2703_p4)
}
  0x3a   :  { %s2707_s24 = scalar_lea.vmem %s95_s29, 256  ;;  %p2712_p6 = scmp.lt.s32.totalorder %s95_s29, %s95_s29 }
  0x3b   :  { %p2708_p5 = scmp.ne.s32.totalorder %s95_s29, %s2707_s24  ;;  %p2713_p7 = scmp.lt.s32.totalorder %s2707_s24, %s2707_s24 }
  0x3d   :  { %p2714_p8 = por %p2713_p7, %p2712_p6 }
  0x3f   :  { %p2715_p9 = pnand %p2714_p8, %p2708_p5 }
  0x41   :  { %2718 = shalt.err (!%p2715_p9)
}
  0x42   :  { %s2984_s3 = smov 64   ;;  %s2985_s30 = smov 4  }
  0x43   :  { %100 = dma.hbm_to_vmem [thread:$0]  %s3735_s6, 256, %s95_s29, [#allocation12], %s2984_s3, %s2984_s3, %s2985_s30  }
  0x44   :  { %s2986_s27 = smov [#allocation14]   ;;  %s2987_s19 = smov [#allocation17]  }
  0x45   :  { %s121_s0 = sshll.u32 %s2986_s27, 4  ;;  %s144_s20 = sshll.u32 %s2987_s19, 4  ;;  %s122_s0 = int_to_ptr.vmem [resolvable:$true] %s121_s0  ;;  %s145_s20 = int_to_ptr.vmem [resolvable:$true] %s144_s20 }
  0x46   :  { %s2719_s2 = scalar_lea.hbm %s3738_s9, 16 }
  0x47   :  { %p2720_p10 = scmp.ne.s32.totalorder %s3738_s9, %s2719_s2  ;;  %p2723_p11 = scmp.lt.u32.totalorder %s2719_s2, %s3738_s9 }
  0x49   :  { %p2725_p12 = pnand %p2723_p11, %p2720_p10 }
  0x4b   :  { %2728 = shalt.err (!%p2725_p12)
}
  0x4c   :  { %s2729_s6 = scalar_lea.vmem %s122_s0, 16  ;;  %s2733_s29 = scalar_lea.vmem %s122_s0, 32 }
  0x4d   :  { %p2730_p13 = scmp.ne.s32.totalorder %s122_s0, %s2729_s6  ;;  %p2734_p0 = scmp.lt.s32.totalorder %s122_s0, %s122_s0 }
  0x4e   :  { %p2735_p1 = scmp.lt.s32.totalorder %s2733_s29, %s2729_s6 }
  0x50   :  { %p2736_p2 = por %p2735_p1, %p2734_p0 }
  0x52   :  { %p2737_p3 = pnand %p2736_p2, %p2730_p13 }
  0x54   :  { %2740 = shalt.err (!%p2737_p3)
}
  0x55   :  { %124 = dma.hbm_to_vmem [thread:$0]  %s3738_s9, 16, %s122_s0, [#allocation15]  }
  0x56   :  { %s2741_s25 = scalar_lea.hbm %s3741_s12, 256 }
  0x57   :  { %p2742_p4 = scmp.ne.s32.totalorder %s3741_s12, %s2741_s25  ;;  %p2745_p5 = scmp.lt.u32.totalorder %s2741_s25, %s3741_s12 }
  0x59   :  { %p2747_p6 = pnand %p2745_p5, %p2742_p4 }
  0x5b   :  { %2750 = shalt.err (!%p2747_p6)
}
  0x5c   :  { %s2751_s23 = scalar_lea.vmem %s145_s20, 256  ;;  %p2756_p8 = scmp.lt.s32.totalorder %s145_s20, %s145_s20 }
  0x5d   :  { %p2752_p7 = scmp.ne.s32.totalorder %s145_s20, %s2751_s23  ;;  %p2757_p9 = scmp.lt.s32.totalorder %s2751_s23, %s2751_s23 }
  0x5f   :  { %p2758_p10 = por %p2757_p9, %p2756_p8 }
  0x61   :  { %p2759_p11 = pnand %p2758_p10, %p2752_p7 }
  0x63   :  { %2762 = shalt.err (!%p2759_p11)
}
  0x64   :  { %150 = dma.hbm_to_vmem [thread:$0]  %s3741_s12, 256, %s145_s20, [#allocation18], %s2984_s3, %s2984_s3, %s2985_s30  }
  0x65   :  { %s2988_s24 = smov [#allocation2]   ;;  %s2989_s29 = smov [#allocation7]  }
  0x66   :  { %s38_s6 = sshll.u32 %s2988_s24, 4  ;;  %s63_s28 = sshll.u32 %s2989_s29, 4  ;;  %s39_s6 = int_to_ptr.vmem [resolvable:$true] %s38_s6  ;;  %s64_s28 = int_to_ptr.vmem [resolvable:$true] %s63_s28 }
  0x67   :  { %s3757_s19 = sld [smem:[#allocation34_spill]] }
  0x6d   :  { %s2763_s25 = scalar_lea.hbm %s3757_s19, 1024 }
  0x6e   :  { %p2764_p12 = scmp.ne.s32.totalorder %s3757_s19, %s2763_s25  ;;  %p2767_p13 = scmp.lt.u32.totalorder %s2763_s25, %s3757_s19 }
  0x70   :  { %p2769_p0 = pnand %p2767_p13, %p2764_p12 }
  0x72   :  { %2772 = shalt.err (!%p2769_p0)
}
  0x73   :  { %s2773_s12 = scalar_lea.vmem %s39_s6, 1024  ;;  %p2778_p2 = scmp.lt.s32.totalorder %s39_s6, %s39_s6 }
  0x74   :  { %p2774_p1 = scmp.ne.s32.totalorder %s39_s6, %s2773_s12  ;;  %p2779_p3 = scmp.lt.s32.totalorder %s2773_s12, %s2773_s12 }
  0x76   :  { %p2780_p4 = por %p2779_p3, %p2778_p2 }
  0x78   :  { %p2781_p5 = pnand %p2780_p4, %p2774_p1 }
  0x7a   :  { %2784 = shalt.err (!%p2781_p5)
}
  0x7b   :  { %s3758_s20 = smov 8   ;;  %s3759_s23 = smov 128  }
  0x7c   :  { %44 = dma.hbm_to_vmem [thread:$0]  %s3757_s19, 1024, %s39_s6, [#allocation3], %s3759_s23, %s3759_s23, %s3758_s20  }
  0x7d   :  { %s3760_s1 = sld [smem:[#allocation36_spill]] }
  0x83   :  { %s2785_s27 = scalar_lea.hbm %s3760_s1, 128 }
  0x84   :  { %p2786_p6 = scmp.ne.s32.totalorder %s3760_s1, %s2785_s27  ;;  %p2789_p7 = scmp.lt.u32.totalorder %s2785_s27, %s3760_s1 }
  0x86   :  { %p2791_p8 = pnand %p2789_p7, %p2786_p6 }
  0x88   :  { %2794 = shalt.err (!%p2791_p8)
}
  0x89   :  { %s2795_s2 = scalar_lea.vmem %s64_s28, 128  ;;  %p2800_p10 = scmp.lt.s32.totalorder %s64_s28, %s64_s28 }
  0x8a   :  { %p2796_p9 = scmp.ne.s32.totalorder %s64_s28, %s2795_s2  ;;  %p2801_p11 = scmp.lt.s32.totalorder %s2795_s2, %s2795_s2 }
  0x8c   :  { %p2802_p12 = por %p2801_p11, %p2800_p10 }
  0x8e   :  { %p2803_p13 = pnand %p2802_p12, %p2796_p9 }
  0x90   :  { %2806 = shalt.err (!%p2803_p13)
}
  0x91   :  { %66 = dma.hbm_to_vmem [thread:$0]  %s3760_s1, 128, %s64_s28, [#allocation6]  }
  0x92   :  { %s2990_s12 = smov [#allocation10]   ;;  %s2991_s23 = smov [#allocation13]  }
  0x93   :  { %s83_s20 = sshll.u32 %s2990_s12, 4  ;;  %s108_s9 = sshll.u32 %s2991_s23, 4  ;;  %s84_s20 = int_to_ptr.vmem [resolvable:$true] %s83_s20  ;;  %s109_s9 = int_to_ptr.vmem [resolvable:$true] %s108_s9 }
  0x94   :  { %s2807_s29 = scalar_lea.hbm %s3733_s4, 64 }
  0x95   :  { %p2808_p0 = scmp.ne.s32.totalorder %s3733_s4, %s2807_s29  ;;  %p2811_p1 = scmp.lt.u32.totalorder %s2807_s29, %s3733_s4 }
  0x97   :  { %p2813_p2 = pnand %p2811_p1, %p2808_p0 }
  0x99   :  { %2816 = shalt.err (!%p2813_p2)
}
  0x9a   :  { %s2817_s28 = scalar_lea.vmem %s84_s20, 64  ;;  %p2822_p4 = scmp.lt.s32.totalorder %s84_s20, %s84_s20 }
  0x9b   :  { %p2818_p3 = scmp.ne.s32.totalorder %s84_s20, %s2817_s28  ;;  %p2823_p5 = scmp.lt.s32.totalorder %s2817_s28, %s2817_s28 }
  0x9d   :  { %p2824_p6 = por %p2823_p5, %p2822_p4 }
  0x9f   :  { %p2825_p7 = pnand %p2824_p6, %p2818_p3 }
  0xa1   :  { %2828 = shalt.err (!%p2825_p7)
}
  0xa2   :  { %86 = dma.hbm_to_vmem [thread:$0]  %s3733_s4, 64, %s84_s20, [#allocation9]  }
  0xa3   :  { %s2829_s19 = scalar_lea.hbm %s3737_s8, 256 }
  0xa4   :  { %p2830_p8 = scmp.ne.s32.totalorder %s3737_s8, %s2829_s19  ;;  %p2833_p9 = scmp.lt.u32.totalorder %s2829_s19, %s3737_s8 }
  0xa6   :  { %p2835_p10 = pnand %p2833_p9, %p2830_p8 }
  0xa8   :  { %2838 = shalt.err (!%p2835_p10)
}
  0xa9   :  { %s2839_s29 = scalar_lea.vmem %s109_s9, 256  ;;  %p2844_p12 = scmp.lt.s32.totalorder %s109_s9, %s109_s9 }
  0xaa   :  { %p2840_p11 = scmp.ne.s32.totalorder %s109_s9, %s2839_s29  ;;  %p2845_p13 = scmp.lt.s32.totalorder %s2839_s29, %s2839_s29 }
  0xac   :  { %p2846_p0 = por %p2845_p13, %p2844_p12 }
  0xae   :  { %p2847_p1 = pnand %p2846_p0, %p2840_p11 }
  0xb0   :  { %2850 = shalt.err (!%p2847_p1)
}
  0xb1   :  { %114 = dma.hbm_to_vmem [thread:$0]  %s3737_s8, 256, %s109_s9, [#allocation12], %s2984_s3, %s2984_s3, %s2985_s30  }
  0xb2   :  { %s2992_s27 = smov [#allocation16]   ;;  %s2993_s26 = smov [#allocation19]  }
  0xb3   :  { %s132_s25 = sshll.u32 %s2992_s27, 4  ;;  %s157_s21 = sshll.u32 %s2993_s26, 4  ;;  %s133_s25 = int_to_ptr.vmem [resolvable:$true] %s132_s25  ;;  %s158_s21 = int_to_ptr.vmem [resolvable:$true] %s157_s21 }
  0xb4   :  { %s2851_s22 = scalar_lea.hbm %s3740_s11, 256 }
  0xb5   :  { %p2852_p2 = scmp.ne.s32.totalorder %s3740_s11, %s2851_s22  ;;  %p2855_p3 = scmp.lt.u32.totalorder %s2851_s22, %s3740_s11 }
  0xb7   :  { %p2857_p4 = pnand %p2855_p3, %p2852_p2 }
  0xb9   :  { %2860 = shalt.err (!%p2857_p4)
}
  0xba   :  { %s2861_s8 = scalar_lea.vmem %s133_s25, 256  ;;  %p2866_p6 = scmp.lt.s32.totalorder %s133_s25, %s133_s25 }
  0xbb   :  { %p2862_p5 = scmp.ne.s32.totalorder %s133_s25, %s2861_s8  ;;  %p2867_p7 = scmp.lt.s32.totalorder %s2861_s8, %s2861_s8 }
  0xbd   :  { %p2868_p8 = por %p2867_p7, %p2866_p6 }
  0xbf   :  { %p2869_p9 = pnand %p2868_p8, %p2862_p5 }
  0xc1   :  { %2872 = shalt.err (!%p2869_p9)
}
  0xc2   :  { %138 = dma.hbm_to_vmem [thread:$0]  %s3740_s11, 256, %s133_s25, [#allocation15], %s2984_s3, %s2984_s3, %s2985_s30  }
  0xc3   :  { %s2873_s29 = scalar_lea.hbm %s3742_s13, 16 }
  0xc4   :  { %p2874_p10 = scmp.ne.s32.totalorder %s3742_s13, %s2873_s29  ;;  %p2877_p11 = scmp.lt.u32.totalorder %s2873_s29, %s3742_s13 }
  0xc6   :  { %p2879_p12 = pnand %p2877_p11, %p2874_p10 }
  0xc8   :  { %2882 = shalt.err (!%p2879_p12)
}
  0xc9   :  { %s2883_s28 = scalar_lea.vmem %s158_s21, 16  ;;  %s2887_s1 = scalar_lea.vmem %s158_s21, 32 }
  0xca   :  { %p2884_p13 = scmp.ne.s32.totalorder %s158_s21, %s2883_s28  ;;  %p2888_p0 = scmp.lt.s32.totalorder %s158_s21, %s158_s21 }
  0xcb   :  { %p2889_p1 = scmp.lt.s32.totalorder %s2887_s1, %s2883_s28 }
  0xcd   :  { %p2890_p2 = por %p2889_p1, %p2888_p0 }
  0xcf   :  { %p2891_p3 = pnand %p2890_p2, %p2884_p13 }
  0xd1   :  { %2894 = shalt.err (!%p2891_p3)
}
  0xd2   :  { %160 = dma.hbm_to_vmem [thread:$0]  %s3742_s13, 16, %s158_s21, [#allocation18]  }
  0xd3   :  { %s2994_s22 = smov [#allocation20]   ;;  %s2895_s12 = scalar_lea.hbm %s3745_s16, 256 }
  0xd4   :  { %s170_s2 = sshll.u32 %s2994_s22, 4  ;;  %p2896_p4 = scmp.ne.s32.totalorder %s3745_s16, %s2895_s12  ;;  %s171_s2 = int_to_ptr.vmem [resolvable:$true] %s170_s2 }
  0xd5   :  { %p2899_p5 = scmp.lt.u32.totalorder %s2895_s12, %s3745_s16 }
  0xd7   :  { %p2901_p6 = pnand %p2899_p5, %p2896_p4 }
  0xd9   :  { %2904 = shalt.err (!%p2901_p6)
}
  0xda   :  { %s2905_s24 = scalar_lea.vmem %s171_s2, 256  ;;  %p2910_p8 = scmp.lt.s32.totalorder %s171_s2, %s171_s2 }
  0xdb   :  { %p2906_p7 = scmp.ne.s32.totalorder %s171_s2, %s2905_s24  ;;  %p2911_p9 = scmp.lt.s32.totalorder %s2905_s24, %s2905_s24 }
  0xdd   :  { %p2912_p10 = por %p2911_p9, %p2910_p8 }
  0xdf   :  { %p2913_p11 = pnand %p2912_p10, %p2906_p7 }
  0xe1   :  { %2916 = shalt.err (!%p2913_p11)
}
  0xe2   :  { %176 = dma.hbm_to_vmem [thread:$0]  %s3745_s16, 256, %s171_s2, [#allocation21], %s2984_s3, %s2984_s3, %s2985_s30  }
  0xe3   :  { %2961 = dma.done.wait [#allocation3], 1024  }
  0xe4   :  { %2962 = vsyncadd [#allocation3], 4294966272 }
  0xe5   :  { %2963 = dma.done.wait [#allocation6], 1152  }
  0xe6   :  { %2964 = vsyncadd [#allocation6], 4294966144 }
  0xe7   :  { %2965 = dma.done.wait [#allocation9], 128  }
  0xe8   :  { %2966 = vsyncadd [#allocation9], 4294967168 }
  0xe9   :  { %2967 = dma.done.wait [#allocation12], 512  }
  0xea   :  { %2968 = vsyncadd [#allocation12], 4294966784 }
  0xeb   :  { %2969 = dma.done.wait [#allocation15], 272  }
  0xec   :  { %2970 = vsyncadd [#allocation15], 4294967024 }
  0xed   :  { %2971 = dma.done.wait [#allocation18], 272  }
  0xee   :  { %2972 = vsyncadd [#allocation18], 4294967024 }
  0xef   :  { %2973 = dma.done.wait [#allocation21], 256  }
  0xf0   :  { %2974 = vsyncadd [#allocation21], 4294967040  ;;  %v2995_v0 = vmov 0.0   ;;  %vm2996_vm0 = vmmov 0   ;;  %v250_v1 = vlaneseq  ;;  %v2505_v3 = vld [vmem:[#allocation11] sm:$0xff]   ;;  %v2506_v4 = vld [vmem:[%s3734_s5] sm:$0xff]  }
  0xf1   :  { %2401 = vmatprep.subr.bf16.mxu0 %v2995_v0  ;;  %2405 = vmatprep.mubr.msk.bf16.mxu0 %vm2996_vm0, %v2995_v0  ;;  %v2507_v5 = vld [vmem:[#allocation11 + $0x8] sm:$0xff]   ;;  %v2508_v7 = vld [vmem:[%s3734_s5 + $0x8] sm:$0xff]   ;;  %vm371_vm1 = vcmask 64512   ;;  %v3274_v8 = vld [vmem:[#allocation2] sm:$0xff]  ;;  %vm314_vm2 = vcmask 261120   ;;  %vm744_vm3 = vcmask 1041409  }
  0xf2   :  { %v3264_v2 = vshrl.u32 %v250_v1, 7  ;;  %2409 = vmatprep.subr.bf16.mxu1 %v2505_v3  ;;  %2402 = vmatpush3.bf16.msra.mxu0 %v2506_v4  ;;  %v3276_v9 = vld [vmem:[#allocation2 + $0x8] sm:$0xff]  ;;  %v3280_v11 = vld [vmem:[#allocation2 + $0x10] sm:$0xff]  ;;  %v3282_v12 = vld [vmem:[#allocation2 + $0x18] sm:$0xff]  ;;  %vm747_vm4 = vcmask 1042434   ;;  %vm750_vm5 = vcmask 1043459  }
  0xf3   :  { %2410 = vmatpush3.bf16.msra.mxu1 %v2505_v3  ;;  %2403 = vmatprep.subr.bf16.mxu0 %v2995_v0  ;;  %v2333_v10 = vpack.c.bf16 %v3276_v9, %v3274_v8  ;;  %v214_v13 = vld [vmem:[#allocation7] sm:$0xff]  ;;  %v2334_v15 = vpack.c.bf16 %v3282_v12, %v3280_v11  ;;  %v3291_v18 = vld [vmem:[#allocation2 + $0x28] sm:$0xff]  ;;  %v3297_v23 = vld [vmem:[#allocation2 + $0x30] sm:$0xff]  ;;  %vm753_vm6 = vcmask 1044484   ;;  %vm756_vm7 = vcmask 1045509  }
  0xf4   :  { %v266_v6 = vsub.s32 2, %v3264_v2  ;;  %2411 = vmatprep.subr.bf16.mxu1 %v2507_v5  ;;  %v3285_v14 = vsub.s32 0, %v3264_v2  ;;  %v372_v16 = vsel %vm371_vm1, %v214_v13, 0.0  ;;  %v3289_v17 = vld [vmem:[#allocation2 + $0x20] sm:$0xff]  ;;  %v223_v20 = vld [vmem:[#allocation8] sm:$0xf] }
  0xf5   :  { %v2335_v21 = vpack.c.bf16 %v3291_v18, %v3289_v17  ;;  %v273_v22 = vsub.s32 3, %v3264_v2  ;;  %2413 = vmatprep.mubr.msk.bf16.mxu1 %vm314_vm2, %v2333_v10  ;;  %373 = vadd.xlane.f32.xlu0 %v372_v16  ;;  %v3299_v24 = vld [vmem:[#allocation2 + $0x38] sm:$0xff]  ;;  %v280_v27 = vsub.s32 4, %v3264_v2  ;;  %v287_v30 = vsub.s32 5, %v3264_v2  ;;  %v2509_v38 = vld [vmem:[%s3739_s10] sm:$0xff]   ;;  %v2510_v39 = vld [vmem:[%s3739_s10 + $0x8] sm:$0xff]  }
  0xf6   :  { %v267_v19 = vrot.slane %v214_v13, %v266_v6  ;;  %2404 = vmatpush3.bf16.msra.mxu0 %v2508_v7  ;;  %v253_v25 = vrot.slane %v214_v13, %v3285_v14  ;;  %v2336_v28 = vpack.c.bf16 %v3299_v24, %v3297_v23  ;;  %v294_v32 = vsub.s32 6, %v3264_v2  ;;  %v3329_v40 = vld [vmem:[#allocation17] sm:$0xff]   ;;  %v3333_v43 = vld [vmem:[#allocation5 + $0x10] sm:$0xff]  ;;  %v3343_v55 = vld [vmem:[#allocation5 + $0x18] sm:$0xff] }
  0xf7   :  { %2412 = vmatpush3.bf16.msra.mxu1 %v2507_v5  ;;  %v274_v26 = vrot.slane %v214_v13, %v273_v22  ;;  %v281_v29 = vrot.slane %v214_v13, %v280_v27  ;;  %v288_v31 = vrot.slane %v214_v13, %v287_v30  ;;  %v259_v33 = vsub.s32 1, %v3264_v2  ;;  %v2515_v41 = vld [vmem:[#allocation13] sm:$0xff]   ;;  %v2516_v42 = vld [vmem:[#allocation13 + $0x8] sm:$0xff]  }
  0xf8   :  { %269 = vbcast.lane.b32.xlu1 %v267_v19, 256  ;;  %2433 = vmatprep.subr.bf16.mxu1 %v2995_v0  ;;  %v3315_v34 = vrot.slane %v214_v13, %v294_v32  ;;  %v301_v35 = vsub.s32 7, %v3264_v2  ;;  %v3337_v47 = vld [vmem:[#allocation5] sm:$0xff]  ;;  %vm759_vm8 = vcmask 1046534   ;;  %vm762_vm9 = vcmask 1047559  }
  0xf9   :  { %2406 = vmatmul.mubr.msk.bf16.vlgmr.msra.gmra.mrb[0].mxu0 %vm314_vm2, %v223_v20  ;;  %v260_v36 = vrot.slane %v214_v13, %v259_v33  ;;  %2421 = vmatprep.subr.bf16.mxu0 %v2515_v41  ;;  %v3349_v4 = vld [vmem:[#allocation5 + $0x20] sm:$0xff]  ;;  %v3359_v33 = vld [vmem:[#allocation5 + $0x28] sm:$0xff]  ;;  %vm2151_vm10 = vcmask 257024  }
  0xfa   :  { %2414 = vmatmul.mubr.msk.bf16.vlgmr.msra.gmra.mrb[0].mxu1 %vm314_vm2, %v2334_v15  ;;  %v3319_v37 = vrot.slane %v214_v13, %v301_v35  ;;  %2422 = vmatpush3.bf16.msra.mxu0 %v2515_v41 }
  0xfb   :  { %2417 = vmatprep.mubr.msk.bf16.mxu1 %vm314_vm2, %v2335_v21  ;;  %2434 = vmatpush3.bf16.msra.mxu1 %v2509_v38 }
  0xfc   :  { %255 = vbcast.lane.b32.xlu1 %v253_v25, 256  ;;  %2435 = vmatprep.subr.bf16.mxu1 %v2995_v0 }
  0xfd   :  { %2423 = vmatprep.subr.bf16.mxu0 %v2516_v42 }
  0xfe   :  { %2424 = vmatpush3.bf16.msra.mxu0 %v2516_v42 }
  0xff   :  { %2436 = vmatpush3.bf16.msra.mxu1 %v2510_v39  ;;  %2441 = vmatprep.subr.bf16.mxu0 %v2995_v0 }
 0x100   :  { %276 = vbcast.lane.b32.xlu1 %v274_v26, 256  ;;  %2449 = vmatprep.subr.bf16.mxu1 %v3329_v40 }
 0x102   :  { %2418 = vmatmul.mubr.msk.bf16.gmra.mrb[4].mxu1 %vm314_vm2, %v2336_v28 }
 0x103   :  { %2437 = vmatprep.mubr.msk.bf16.mxu1 %vm2996_vm0, %v2995_v0 }
 0x104   :  { %283 = vbcast.lane.b32.xlu1 %v281_v29, 256 }
 0x108   :  { %290 = vbcast.lane.b32.xlu1 %v288_v31, 256 }
 0x10b   :  { %262 = vbcast.lane.b32.xlu0 %v260_v36, 256 }
 0x10c   :  { %297 = vbcast.lane.b32.xlu1 %v3315_v34, 256 }
 0x10f   :  { %1017 = vbcast.lane.b32.xlu0 %v260_v36, 256 }
 0x110   :  { %304 = vbcast.lane.b32.xlu1 %v3319_v37, 256 }
 0x113   :  { %1038 = vbcast.lane.b32.xlu0 %v281_v29, 256 }
 0x114   :  { %1010 = vbcast.lane.b32.xlu1 %v253_v25, 256 }
 0x118   :  { %1024 = vbcast.lane.b32.xlu1 %v267_v19, 256 }
 0x11c   :  { %1031 = vbcast.lane.b32.xlu1 %v274_v26, 256 }
 0x120   :  { %1045 = vbcast.lane.b32.xlu1 %v288_v31, 256 }
 0x16a   :  { %v270_v44 = vpop.permute.xlu1 %269 }
 0x16b   :  { %v308_v45 = vmul.f32 %v270_v44, %v3280_v11  ;;  %v1218_v46 = vmul.f32 %v3333_v43, %v270_v44 }
 0x16d   :  { %v329_v48 = vsel %vm314_vm2, %v308_v45, 0.0  ;;  %v1238_v49 = vsel %vm314_vm2, %v1218_v46, 0.0 }
 0x16e   :  { %v256_v50 = vpop.permute.xlu1 %255  ;;  %v330_v51 = vrot.slane %v329_v48, 4  ;;  %v1239_v54 = vrot.slane %v1238_v49, 4 }
 0x16f   :  { %v306_v52 = vmul.f32 %v256_v50, %v3274_v8  ;;  %v1216_v53 = vmul.f32 %v3337_v47, %v256_v50 }
 0x170   :  { %v331_v60 = vadd.f32 %v330_v51, %v329_v48  ;;  %v1240_v63 = vadd.f32 %v1239_v54, %v1238_v49 }
 0x171   :  { %v315_v56 = vsel %vm314_vm2, %v306_v52, 0.0  ;;  %v1224_v57 = vsel %vm314_vm2, %v1216_v53, 0.0 }
 0x172   :  { %v316_v58 = vrot.slane %v315_v56, 4  ;;  %v277_v59 = vpop.permute.xlu1 %276  ;;  %v1225_v1 = vrot.slane %v1224_v57, 4  ;;  %v332_v6 = vrot.slane %v331_v60, 2  ;;  %v1241_v11 = vrot.slane %v1240_v63, 2 }
 0x173   :  { %v309_v61 = vmul.f32 %v277_v59, %v3282_v12  ;;  %v1219_v62 = vmul.f32 %v3343_v55, %v277_v59 }
 0x174   :  { %v317_v3 = vadd.f32 %v316_v58, %v315_v56  ;;  %v1226_v13 = vadd.f32 %v1225_v1, %v1224_v57  ;;  %v333_v21 = vadd.f32 %v332_v6, %v331_v60  ;;  %v1242_v26 = vadd.f32 %v1241_v11, %v1240_v63 }
 0x175   :  { %v336_v7 = vsel %vm314_vm2, %v309_v61, 0.0  ;;  %v1245_v8 = vsel %vm314_vm2, %v1219_v62, 0.0 }
 0x176   :  { %v284_v5 = vpop.permute.xlu1 %283  ;;  %v318_v15 = vrot.slane %v317_v3, 2  ;;  %v337_v16 = vrot.slane %v336_v7, 4  ;;  %v1246_v19 = vrot.slane %v1245_v8, 4  ;;  %v1227_v27 = vrot.slane %v1226_v13, 2 }
 0x177   :  { %v310_v10 = vmul.f32 %v284_v5, %v3289_v17  ;;  %v1220_v12 = vmul.f32 %v3349_v4, %v284_v5  ;;  %v334_v38 = vrot.slane %v333_v21, 1  ;;  %v1243_v41 = vrot.slane %v1242_v26, 1 }
 0x178   :  { %v319_v28 = vadd.f32 %v318_v15, %v317_v3  ;;  %v338_v30 = vadd.f32 %v337_v16, %v336_v7  ;;  %v1247_v31 = vadd.f32 %v1246_v19, %v1245_v8  ;;  %v3362_v42 = vadd.f32 %v1227_v27, %v1226_v13 }
 0x179   :  { %v343_v22 = vsel %vm314_vm2, %v310_v10, 0.0  ;;  %v1252_v29 = vsel %vm314_vm2, %v1220_v12, 0.0  ;;  %v3366_v53 = vadd.f32 %v334_v38, %v333_v21  ;;  %v3369_v56 = vadd.f32 %v1243_v41, %v1242_v26  ;;  %v3380_v10 = vld [vmem:[#allocation5 + $0x30] sm:$0xff] }
 0x17a   :  { %v291_v20 = vpop.permute.xlu1 %290  ;;  %v344_v32 = vrot.slane %v343_v22, 4  ;;  %v320_v44 = vrot.slane %v319_v28, 1  ;;  %v339_v48 = vrot.slane %v338_v30, 2  ;;  %v1248_v49 = vrot.slane %v1247_v31, 2 }
 0x17b   :  { %v311_v25 = vmul.f32 %v291_v20, %v3291_v18  ;;  %v1253_v18 = vrot.slane %v1252_v29, 4  ;;  %v1221_v45 = vmul.f32 %v3359_v33, %v291_v20 }
 0x17c   :  { %v345_v50 = vadd.f32 %v344_v32, %v343_v22  ;;  %v3372_v60 = vadd.f32 %v320_v44, %v319_v28  ;;  %v340_v1 = vadd.f32 %v339_v48, %v338_v30  ;;  %v3376_v3 = vadd.f32 %v1248_v49, %v1247_v31  ;;  %v3385_v28 = vld [vmem:[#allocation5 + $0x38] sm:$0xff] }
 0x17d   :  { %v350_v17 = vsel %vm314_vm2, %v311_v25, 0.0  ;;  %v1254_v57 = vadd.f32 %v1253_v18, %v1252_v29  ;;  %v1259_v62 = vsel %vm314_vm2, %v1221_v45, 0.0 }
 0x17e   :  { %v351_v35 = vrot.slane %v350_v17, 4  ;;  %v298_v36 = vpop.permute.xlu1 %297  ;;  %v346_v5 = vrot.slane %v345_v50, 2  ;;  %v1260_v12 = vrot.slane %v1259_v62, 4  ;;  %v341_v25 = vrot.slane %v340_v1, 1 }
 0x17f   :  { %v312_v39 = vmul.f32 %v298_v36, %v3297_v23  ;;  %v1229_v23 = vrot.slane %v3362_v42, 1  ;;  %v1255_v13 = vrot.slane %v1254_v57, 2  ;;  %v1222_v27 = vmul.f32 %v3380_v10, %v298_v36 }
 0x180   :  { %v352_v51 = vadd.f32 %v351_v35, %v350_v17 }
 0x181   :  { %v357_v46 = vsel %vm314_vm2, %v312_v39, 0.0  ;;  %v1266_v36 = vsel %vm314_vm2, %v1222_v27, 0.0 }
 0x182   :  { %v305_v52 = vpop.permute.xlu1 %304  ;;  %v374_v58 = vpop.xlane.xlu0 %373  ;;  %v358_v59 = vrot.slane %v357_v46, 4  ;;  %v353_v6 = vrot.slane %v352_v51, 2 }
 0x183   :  { %v313_v54 = vmul.f32 %v305_v52, %v3299_v24  ;;  %v375_v61 = vmax.f32 %v374_v58, 1e-06  ;;  %v3378_v24 = vld [vmem:[#allocation5 + $0x8] sm:$0xff]  ;;  %v1223_v41 = vmul.f32 %v3385_v28, %v305_v52 }
 0x184   :  { %v359_v19 = vadd.f32 %v358_v59, %v357_v46  ;;  %v354_v26 = vadd.f32 %v353_v6, %v352_v51  ;;  %v347_v46 = vadd.f32 %v346_v5, %v345_v50  ;;  %v1256_v51 = vadd.f32 %v1255_v13, %v1254_v57 }
 0x185   :  { %v364_v63 = vsel %vm314_vm2, %v313_v54, 0.0  ;;  %v378_v7 = vrot.slane %v375_v61, 2  ;;  %v379_v8 = vrot.slane %v375_v61, 3  ;;  %2521 = vrcp.f32 %v375_v61 }
 0x186   :  { %v365_v11 = vrot.slane %v364_v63, 4  ;;  %v381_v15 = vrot.slane %v375_v61, 5  ;;  %v263_v16 = vpop.permute.xlu0 %262  ;;  %v377_v20 = vrot.slane %v375_v61, 1  ;;  %v380_v29 = vrot.slane %v375_v61, 4 }
 0x187   :  { %2523 = vrcp.f32 %v378_v7  ;;  %v307_v21 = vmul.f32 %v263_v16, %v3276_v9  ;;  %v1217_v22 = vmul.f32 %v3378_v24, %v263_v16  ;;  %v382_v38 = vrot.slane %v375_v61, 6 }
 0x188   :  { %2525 = vrcp.f32 %v379_v8  ;;  %v366_v31 = vadd.f32 %v365_v11, %v364_v63  ;;  %v1261_v9 = vadd.f32 %v1260_v12, %v1259_v62  ;;  %v360_v39 = vrot.slane %v359_v19, 2 }
 0x189   :  { %v322_v17 = vsel %vm314_vm2, %v307_v21, 0.0  ;;  %v1231_v30 = vsel %vm314_vm2, %v1217_v22, 0.0  ;;  %2527 = vrcp.f32 %v381_v15  ;;  %v383_v45 = vrot.slane %v375_v61, 7 }
 0x18a   :  { %v323_v32 = vrot.slane %v322_v17, 4  ;;  %v1232_v35 = vrot.slane %v1231_v30, 4  ;;  %2529 = vrcp.f32 %v377_v20  ;;  %v355_v48 = vrot.slane %v354_v26, 1 }
 0x18b   :  { %2531 = vrcp.f32 %v380_v29  ;;  %v367_v49 = vrot.slane %v366_v31, 2  ;;  %v342_v62 = vadd.f32 %v341_v25, %v340_v1  ;;  %v361_v63 = vadd.f32 %v360_v39, %v359_v19 }
 0x18c   :  { %v324_v18 = vadd.f32 %v323_v32, %v322_v17  ;;  %v1233_v44 = vadd.f32 %v1232_v35, %v1231_v30  ;;  %2533 = vrcp.f32 %v382_v38  ;;  %v1267_v6 = vrot.slane %v1266_v36, 4 }
 0x18d   :  { %v1273_v52 = vsel %vm314_vm2, %v1223_v41, 0.0  ;;  %v1262_v7 = vrot.slane %v1261_v9, 2  ;;  %2535 = vrcp.f32 %v383_v45  ;;  %v1250_v50 = vrot.slane %v3376_v3, 1 }
 0x18e   :  { %v325_v54 = vrot.slane %v324_v18, 2  ;;  %v1234_v58 = vrot.slane %v1233_v44, 2  ;;  %v348_v5 = vrot.slane %v347_v46, 1  ;;  %v356_v15 = vadd.f32 %v355_v48, %v354_v26 }
 0x18f   :  { %v3391_v59 = vpop.eup %2521  ;;  %v368_v57 = vadd.f32 %v367_v49, %v366_v31  ;;  %v1274_v19 = vrot.slane %v1273_v52, 4  ;;  %v362_v22 = vrot.slane %v361_v63, 1  ;;  %v1268_v25 = vadd.f32 %v1267_v6, %v1266_v36 }
 0x190   :  { %v326_v8 = vadd.f32 %v325_v54, %v324_v18  ;;  %v1235_v11 = vadd.f32 %v1234_v58, %v1233_v44  ;;  %v393_v1 = vmul.f32 %v3391_v59, %v3372_v60  ;;  %v1257_v29 = vrot.slane %v1256_v51, 1 }
 0x191   :  { %v2524_v61 = vpop.eup %2523  ;;  %v1263_v26 = vadd.f32 %v1262_v7, %v1261_v9  ;;  %v369_v35 = vrot.slane %v368_v57, 1  ;;  %v349_v38 = vadd.f32 %v348_v5, %v347_v46  ;;  %v1275_v18 = vadd.f32 %v1274_v19, %v1273_v52 }
 0x192   :  { %v3395_v13 = vpop.eup %2525  ;;  %v397_v12 = vmul.f32 %v2524_v61, %v3366_v53  ;;  %v327_v16 = vrot.slane %v326_v8, 1  ;;  %v1236_v21 = vrot.slane %v1235_v11, 1  ;;  %v719_v41 = vpack.c.bf16 %v393_v1, %v393_v1 }
 0x193   :  { %v399_v20 = vmul.f32 %v3395_v13, %v342_v62  ;;  %v3401_v27 = vpop.eup %2527  ;;  %v363_v48 = vadd.f32 %v362_v22, %v361_v63  ;;  %v1269_v9 = vrot.slane %v1268_v25, 2  ;;  %v1230_v54 = vadd.f32 %v1229_v23, %v3362_v42 }
 0x194   :  { %v721_v17 = vpack.c.bf16 %v397_v12, %v397_v12  ;;  %v328_v30 = vadd.f32 %v327_v16, %v326_v8  ;;  %v2530_v31 = vpop.eup %2529  ;;  %v403_v53 = vmul.f32 %v3401_v27, %v356_v15  ;;  %v1237_v60 = vadd.f32 %v1236_v21, %v1235_v11 }
 0x195   :  { %v722_v32 = vpack.c.bf16 %v399_v20, %v399_v20  ;;  %v2532_v44 = vpop.eup %2531  ;;  %v1251_v58 = vadd.f32 %v1250_v50, %v3376_v3  ;;  %v1258_v46 = vadd.f32 %v1257_v29, %v1256_v51  ;;  %v1264_v7 = vrot.slane %v1263_v26, 1 }
 0x196   :  { %v395_v39 = vmul.f32 %v2530_v31, %v328_v30  ;;  %v724_v36 = vpack.c.bf16 %v403_v53, %v403_v53  ;;  %v737_v45 = vunpack.c.l.b16 %v721_v17  ;;  %v3404_v49 = vpop.eup %2533  ;;  %v1281_v52 = vmul.f32 %v2530_v31, %v1237_v60 }
 0x197   :  { %v738_v6 = vunpack.c.l.b16 %v722_v32  ;;  %v370_v8 = vadd.f32 %v369_v35, %v368_v57  ;;  %v2536_v11 = vpop.eup %2535  ;;  %v735_v5 = vunpack.c.l.b16 %v719_v41  ;;  %v401_v15 = vmul.f32 %v2532_v44, %v349_v38 }
 0x198   :  { %v720_v62 = vpack.c.bf16 %v395_v39, %v395_v39  ;;  %v1276_v12 = vrot.slane %v1275_v18, 2  ;;  %v740_v16 = vunpack.c.l.b16 %v724_v36  ;;  %v746_v1 = vrot.slane %v737_v45, 6 }
 0x199   :  { %v405_v19 = vmul.f32 %v3404_v49, %v363_v48  ;;  %v1270_v42 = vadd.f32 %v1269_v9, %v1268_v25  ;;  %v1282_v23 = vmul.f32 %v2524_v61, %v3369_v56  ;;  %v749_v50 = vrot.slane %v738_v6, 5 }
 0x19a   :  { %v736_v63 = vunpack.c.l.b16 %v720_v62  ;;  %v723_v20 = vpack.c.bf16 %v401_v15, %v401_v15  ;;  %v1280_v51 = vmul.f32 %v3391_v59, %v1230_v54  ;;  %v1600_v21 = vpack.c.bf16 %v1281_v52, %v1281_v52 }
 0x19b   :  { %v725_v22 = vpack.c.bf16 %v405_v19, %v405_v19  ;;  %v407_v57 = vmul.f32 %v2536_v11, %v370_v8  ;;  %v1265_v29 = vadd.f32 %v1264_v7, %v1263_v26  ;;  %v1277_v31 = vadd.f32 %v1276_v12, %v1275_v18  ;;  %v2512_v19 = vld [vmem:[#allocation17 + $0x8] sm:$0xff]  }
 0x19c   :  { %v743_v3 = vrot.slane %v736_v63, 7  ;;  %v739_v30 = vunpack.c.l.b16 %v723_v20  ;;  %v755_v53 = vrot.slane %v740_v16, 3  ;;  %v1283_v25 = vmul.f32 %v3395_v13, %v1251_v58 }
 0x19d   :  { %v741_v60 = vunpack.c.l.b16 %v725_v22  ;;  %v1601_v56 = vpack.c.bf16 %v1282_v23, %v1282_v23  ;;  %v1271_v38 = vrot.slane %v1270_v42, 1  ;;  %v1599_v59 = vpack.c.bf16 %v1280_v51, %v1280_v51 }
 0x19e   :  { %v745_v17 = vsel %vm744_vm3, %v743_v3, %v735_v5  ;;  %v752_v35 = vrot.slane %v739_v30, 4  ;;  %v1616_v39 = vunpack.c.l.b16 %v1600_v21  ;;  %v726_v36 = vpack.c.bf16 %v407_v57, %v407_v57 }
 0x19f   :  { %v748_v32 = vsel %vm747_vm4, %v746_v1, %v745_v17  ;;  %v758_v41 = vrot.slane %v741_v60, 2  ;;  %v1284_v45 = vmul.f32 %v2532_v44, %v1258_v46  ;;  %v1602_v48 = vpack.c.bf16 %v1283_v25, %v1283_v25 }
 0x1a0   :  { %v751_v61 = vsel %vm750_vm5, %v749_v50, %v748_v32  ;;  %v742_v9 = vunpack.c.l.b16 %v726_v36  ;;  %v1278_v54 = vrot.slane %v1277_v31, 1  ;;  %v1617_v62 = vunpack.c.l.b16 %v1601_v56 }
 0x1a1   :  { %v754_v26 = vsel %vm753_vm6, %v752_v35, %v751_v61  ;;  %v1272_v58 = vadd.f32 %v1271_v38, %v1270_v42  ;;  %v1285_v6 = vmul.f32 %v3401_v27, %v1265_v29  ;;  %v1615_v7 = vunpack.c.l.b16 %v1599_v59 }
 0x1a2   :  { %v757_v18 = vsel %vm756_vm7, %v755_v53, %v754_v26  ;;  %v1623_v52 = vrot.slane %v1616_v39, 7  ;;  %v761_v8 = vrot.slane %v742_v9, 1  ;;  %v1603_v5 = vpack.c.bf16 %v1284_v45, %v1284_v45 }
 0x1a3   :  { %v760_v13 = vsel %vm759_vm8, %v758_v41, %v757_v18  ;;  %v2341_v63 = vpack.c.bf16 %v3378_v24, %v3337_v47  ;;  %v1618_v44 = vunpack.c.l.b16 %v1602_v48  ;;  %v1279_v15 = vadd.f32 %v1278_v54, %v1277_v31 }
 0x1a4   :  { %v763_v46 = vsel %vm762_vm9, %v761_v8, %v760_v13  ;;  %v1625_v12 = vrot.slane %v1617_v62, 6  ;;  %v1286_v16 = vmul.f32 %v3404_v49, %v1272_v58  ;;  %v1604_v42 = vpack.c.bf16 %v1285_v6, %v1285_v6 }
 0x1a5   :  { %v764_v1 = vpack.c.b16 %v763_v46, %v763_v46  ;;  %v1624_v23 = vsel %vm744_vm3, %v1623_v52, %v1615_v7  ;;  %v1619_v27 = vunpack.c.l.b16 %v1603_v5  ;;  %v1627_v3 = vrot.slane %v1618_v44, 5  ;;  %v2517_v44 = vld [vmem:[#allocation16] sm:$0xff]  }
 0x1a6   :  { %v1287_v50 = vmul.f32 %v2536_v11, %v1279_v15  ;;  %v1626_v47 = vsel %vm747_vm4, %v1625_v12, %v1624_v23  ;;  %v1605_v24 = vpack.c.bf16 %v1286_v16, %v1286_v16  ;;  %v1620_v20 = vunpack.c.l.b16 %v1604_v42  ;;  %v2513_v11 = vld [vmem:[#allocation20] sm:$0xff]   ;;  %v1189_v23 = vld [vmem:[#allocation10] sm:$0xf] }
 0x1a7   :  { %2438 = vmatmul.mubr.msk.bf16.vlgmr.msra.gmra.mrb[8].mxu1 %vm314_vm2, %v764_v1  ;;  %v2342_v49 = vpack.c.bf16 %v3343_v55, %v3333_v43  ;;  %v1629_v51 = vrot.slane %v1619_v27, 4  ;;  %v2343_v21 = vpack.c.bf16 %v3359_v33, %v3349_v4  ;;  %v1628_v22 = vsel %vm750_vm5, %v1627_v3, %v1626_v47  ;;  %v2514_v43 = vld [vmem:[#allocation20 + $0x8] sm:$0xff]   ;;  %v2520_v3 = vld [vmem:[%s3743_s14 + $0x8] sm:$0xff]  }
 0x1a8   :  { %2450 = vmatpush3.bf16.msra.mxu1 %v3329_v40  ;;  %2453 = vmatprep.mubr.msk.bf16.mxu1 %vm314_vm2, %v2341_v63  ;;  %v1606_v57 = vpack.c.bf16 %v1287_v50, %v1287_v50  ;;  %v1621_v40 = vunpack.c.l.b16 %v1605_v24  ;;  %v1631_v29 = vrot.slane %v1620_v20, 3  ;;  %v2344_v33 = vpack.c.bf16 %v3385_v28, %v3380_v10  ;;  %v2518_v15 = vld [vmem:[#allocation16 + $0x8] sm:$0xff]  }
 0x1a9   :  { %2451 = vmatprep.subr.bf16.mxu1 %v2512_v19  ;;  %v1630_v17 = vsel %vm753_vm6, %v1629_v51, %v1628_v22  ;;  %v2519_v27 = vld [vmem:[%s3743_s14] sm:$0xff]   ;;  %v2997_v22 = vmov 1966171168  }
 0x1aa   :  { %v1622_v30 = vunpack.c.l.b16 %v1606_v57  ;;  %v1633_v55 = vrot.slane %v1621_v40, 2  ;;  %v1632_v4 = vsel %vm756_vm7, %v1631_v29, %v1630_v17  ;;  %v823_v57 = vunpack.c.l.s4 %v2997_v22 }
 0x1ac   :  { %2452 = vmatpush3.bf16.msra.mxu1 %v2512_v19  ;;  %v1635_v31 = vrot.slane %v1622_v30, 1  ;;  %v1634_v53 = vsel %vm759_vm8, %v1633_v55, %v1632_v4  ;;  %v824_v40 = vunpack.c.0.s8 %v823_v57 }
 0x1ad   :  { %2473 = vmatprep.subr.bf16.mxu1 %v2995_v0 }
 0x1ae   :  { %v1636_v32 = vsel %vm762_vm9, %v1635_v31, %v1634_v53 }
 0x1af   :  { %2454 = vmatmul.mubr.msk.bf16.vlgmr.msra.gmra.mrb[12].mxu1 %vm314_vm2, %v2342_v49  ;;  %v1637_v25 = vpack.c.b16 %v1636_v32, %v1636_v32 }
 0x1b0   :  { %2457 = vmatprep.mubr.msk.bf16.mxu1 %vm314_vm2, %v2343_v21  ;;  %2474 = vmatpush3.bf16.msra.mxu1 %v2513_v11 }
 0x1b1   :  { %2475 = vmatprep.subr.bf16.mxu1 %v2995_v0 }
 0x1b4   :  { %2476 = vmatpush3.bf16.msra.mxu1 %v2514_v43  ;;  %v827_v43 = vsub.s32 %v824_v40, %v3264_v2 }
 0x1b7   :  { %2458 = vmatmul.mubr.msk.bf16.gmra.mrb[16].mxu1 %vm314_vm2, %v2344_v33 }
 0x1b8   :  { %2477 = vmatprep.mubr.msk.bf16.mxu1 %vm2996_vm0, %v2995_v0 }
 0x1bf   :  { %2478 = vmatmul.mubr.msk.bf16.vlgmr.msra.gmra.mrb[20].mxu1 %vm314_vm2, %v1637_v25 }
 0x1cc   :  { %v457_v60 = vpop.f32.mrb[0].mxu0 }
 0x1cd   :  { %v2415_v56 = vpop.f32.mrb[0].mxu1  ;;  %v2407_v35 = vpop.f32.mrb[1].mxu0 }
 0x1ce   :  { %v574_v61 = vadd.f32 %v2415_v56, %v457_v60  ;;  %v541_v38 = vpop.f32.mrb[1].mxu1  ;;  %v460_v28 = vpop.f32.mrb[2].mxu0 }
 0x1cf   :  { %v572_v10 = vadd.f32 %v541_v38, %v457_v60  ;;  %v2416_v59 = vpop.f32.mrb[2].mxu1  ;;  %v2408_v41 = vpop.f32.mrb[3].mxu0 }
 0x1d0   :  { %2537 = vtanh.f32 %v574_v61  ;;  %v575_v39 = vadd.f32 %v2416_v59, %v457_v60  ;;  %v544_v36 = vpop.f32.mrb[3].mxu1 }
 0x1d1   :  { %2539 = vtanh.f32 %v572_v10  ;;  %v573_v26 = vadd.f32 %v544_v36, %v457_v60 }
 0x1d2   :  { %2541 = vtanh.f32 %v575_v39 }
 0x1d3   :  { %2543 = vtanh.f32 %v573_v26 }
 0x1d5   :  { %v2419_v45 = vpop.f32.mrb[4].mxu1 }
 0x1d6   :  { %v578_v48 = vadd.f32 %v2419_v45, %v457_v60  ;;  %v557_v18 = vpop.f32.mrb[5].mxu1  ;;  %v2268_v45 = vld [vmem:[#allocation14] ss:$0 sm:$0xff] }
 0x1d7   :  { %v576_v9 = vadd.f32 %v557_v18, %v457_v60  ;;  %v2420_v54 = vpop.f32.mrb[6].mxu1 }
 0x1d8   :  { %2545 = vtanh.f32 %v578_v48  ;;  %v579_v62 = vadd.f32 %v2420_v54, %v457_v60  ;;  %v560_v13 = vpop.f32.mrb[7].mxu1 }
 0x1d9   :  { %2547 = vtanh.f32 %v576_v9  ;;  %v577_v58 = vadd.f32 %v560_v13, %v457_v60 }
 0x1da   :  { %v2538_v6 = vpop.eup %2537  ;;  %2549 = vtanh.f32 %v579_v62 }
 0x1db   :  { %v2540_v7 = vpop.eup %2539  ;;  %2551 = vtanh.f32 %v577_v58 }
 0x1dc   :  { %v2542_v52 = vpop.eup %2541 }
 0x1dd   :  { %v2544_v8 = vpop.eup %2543  ;;  %v2338_v5 = vpack.c.bf16 %v2542_v52, %v2538_v6 }
 0x1de   :  { %v2337_v63 = vpack.c.bf16 %v2544_v8, %v2540_v7 }
 0x1e0   :  { %2425 = vmatprep.mubr.msk.bf16.mxu0 %vm314_vm2, %v2337_v63 }
 0x1e1   :  { %2426 = vmatmul.mubr.msk.bf16.vlgmr.msra.gmra.mrb[4].mxu0 %vm314_vm2, %v2338_v5 }
 0x1e2   :  { %v2546_v46 = vpop.eup %2545  ;;  %2442 = vmatpush3.bf16.msra.mxu0 %v2517_v44 }
 0x1e3   :  { %v2548_v12 = vpop.eup %2547  ;;  %2443 = vmatprep.subr.bf16.mxu0 %v2995_v0 }
 0x1e4   :  { %v2550_v16 = vpop.eup %2549 }
 0x1e5   :  { %v2552_v1 = vpop.eup %2551  ;;  %v2340_v19 = vpack.c.bf16 %v2550_v16, %v2546_v46 }
 0x1e6   :  { %v2339_v42 = vpack.c.bf16 %v2552_v1, %v2548_v12  ;;  %2444 = vmatpush3.bf16.msra.mxu0 %v2518_v15 }
 0x1e7   :  { %2461 = vmatprep.subr.bf16.mxu0 %v2519_v27 }
 0x1e8   :  { %2429 = vmatprep.mubr.msk.bf16.mxu0 %vm314_vm2, %v2339_v42 }
 0x1e9   :  { %2430 = vmatmul.mubr.msk.bf16.gmra.mrb[8].mxu0 %vm314_vm2, %v2340_v19 }
 0x1ea   :  { %2445 = vmatprep.mubr.msk.bf16.mxu0 %vm2996_vm0, %v2995_v0 }
 0x1f1   :  { %2446 = vmatmul.mubr.msk.bf16.vlgmr.msra.gmra.mrb[12].mxu0 %vm314_vm2, %v1189_v23 }
 0x1f2   :  { %2462 = vmatpush3.bf16.msra.mxu0 %v2519_v27 }
 0x1f3   :  { %2463 = vmatprep.subr.bf16.mxu0 %v2520_v3 }
 0x1f6   :  { %2464 = vmatpush3.bf16.msra.mxu0 %v2520_v3 }
 0x27a   :  { %v814_v50 = vpop.f32.mrb[8].mxu1 }
 0x27b   :  { %v2439_v47 = vpop.f32.mrb[9].mxu1  ;;  %v828_v28 = vrot.slane %v814_v50, %v827_v43  ;;  %v821_v59 = vcombine.high %v814_v50, %v814_v50 }
 0x27c   :  { %v817_v24 = vpop.f32.mrb[10].mxu1 }
 0x27d   :  { %v2440_v20 = vpop.f32.mrb[11].mxu1  ;;  %v836_v2 = vcombine.high %v828_v28, %v828_v28  ;;  %v844_v39 = vrot.slane %v828_v28, %v827_v43  ;;  %v835_v41 = vrot.slane %v821_v59, %v827_v43 }
 0x27f   :  { %v858_v36 = vrot.slane %v836_v2, %v827_v43  ;;  %v866_v26 = vcombine.high %v844_v39, %v844_v39  ;;  %v837_v48 = vcombine.high %v835_v41, %v835_v41  ;;  %v851_v54 = vrot.slane %v835_v41, %v827_v43 }
 0x280   :  { %v873_v7 = vrot.slane %v844_v39, %v3285_v14 }
 0x281   :  { %v868_v18 = vcombine.high %v858_v36, %v858_v36  ;;  %v881_v13 = vrot.slane %v866_v26, %v3285_v14  ;;  %v865_v8 = vrot.slane %v837_v48, %v827_v43  ;;  %v877_v16 = vrot.slane %v858_v36, %v3285_v14 }
 0x282   :  { %v3463_v0 = vpop.f32.mrb[12].mxu1  ;;  %v867_v42 = vcombine.high %v851_v54, %v851_v54 }
 0x283   :  { %v3465_v49 = vpop.f32.mrb[13].mxu1  ;;  %v885_v44 = vrot.slane %v868_v18, %v3285_v14  ;;  %v869_v50 = vcombine.high %v865_v8, %v865_v8 }
 0x284   :  { %v3467_v51 = vpop.f32.mrb[14].mxu1  ;;  %v897_v22 = vrot.slane %v867_v42, %v3285_v14 }
 0x285   :  { %v3469_v21 = vpop.f32.mrb[15].mxu1 }
 0x28a   :  { %v3471_v11 = vpop.f32.mrb[16].mxu1 }
 0x28b   :  { %v3473_v29 = vpop.f32.mrb[17].mxu1 }
 0x28c   :  { %v3475_v17 = vpop.f32.mrb[18].mxu1 }
 0x28d   :  { %v3477_v30 = vpop.f32.mrb[19].mxu1 }
 0x292   :  { %v1687_v55 = vpop.f32.mrb[20].mxu1 }
 0x293   :  { %v1694_v4 = vcombine.high %v1687_v55, %v1687_v55  ;;  %v1701_v33 = vrot.slane %v1687_v55, %v827_v43  ;;  %v2479_v31 = vpop.f32.mrb[21].mxu1 }
 0x294   :  { %v1690_v53 = vpop.f32.mrb[22].mxu1  ;;  %v901_v31 = vrot.slane %v869_v50, %v3285_v14 }
 0x295   :  { %v1708_v32 = vrot.slane %v1694_v4, %v827_v43  ;;  %v1709_v25 = vcombine.high %v1701_v33, %v1701_v33  ;;  %v3480_v60 = vrot.slane %v1701_v33, %v827_v43  ;;  %v2480_v56 = vpop.f32.mrb[23].mxu1 }
 0x296   :  { %v893_v56 = vrot.slane %v865_v8, %v3285_v14 }
 0x297   :  { %v1710_v61 = vcombine.high %v1708_v32, %v1708_v32  ;;  %v3482_v35 = vrot.slane %v1708_v32, %v827_v43  ;;  %v3484_v38 = vrot.slane %v1709_v25, %v827_v43 }
 0x299   :  { %v3486_v10 = vrot.slane %v1710_v61, %v827_v43  ;;  %v889_v43 = vrot.slane %v851_v54, %v3285_v14 }
 0x2b4   :  { %v2427_v9 = vpop.f32.mrb[4].mxu0 }
 0x2b5   :  { %v713_v62 = vadd.f32 %v2427_v9, %v2268_v45  ;;  %v674_v58 = vpop.f32.mrb[5].mxu0 }
 0x2b6   :  { %v711_v6 = vadd.f32 %v2268_v45, %v674_v58  ;;  %v2428_v52 = vpop.f32.mrb[6].mxu0 }
 0x2b7   :  { %v912_v5 = vadd.f32 %v881_v13, %v713_v62  ;;  %v714_v63 = vadd.f32 %v2428_v52, %v2268_v45  ;;  %v677_v46 = vpop.f32.mrb[7].mxu0 }
 0x2b8   :  { %v910_v15 = vadd.f32 %v873_v7, %v711_v6  ;;  %v712_v12 = vadd.f32 %v2268_v45, %v677_v46 }
 0x2b9   :  { %v2274_v1 = vmul.f32 -1.442695, %v912_v5  ;;  %v913_v19 = vadd.f32 %v885_v44, %v714_v63 }
 0x2ba   :  { %v2272_v23 = vmul.f32 -1.442695, %v910_v15  ;;  %v911_v27 = vadd.f32 %v877_v16, %v712_v12 }
 0x2bb   :  { %2553 = vpow2.f32 %v2274_v1  ;;  %v2275_v3 = vmul.f32 -1.442695, %v913_v19 }
 0x2bc   :  { %2555 = vpow2.f32 %v2272_v23  ;;  %v2273_v47 = vmul.f32 -1.442695, %v911_v27  ;;  %v2431_v24 = vpop.f32.mrb[8].mxu0 }
 0x2bd   :  { %2557 = vpow2.f32 %v2275_v3  ;;  %v717_v20 = vadd.f32 %v2431_v24, %v2268_v45  ;;  %v690_v57 = vpop.f32.mrb[9].mxu0 }
 0x2be   :  { %2559 = vpow2.f32 %v2273_v47  ;;  %v715_v40 = vadd.f32 %v2268_v45, %v690_v57  ;;  %v2432_v55 = vpop.f32.mrb[10].mxu0 }
 0x2bf   :  { %v916_v4 = vadd.f32 %v897_v22, %v717_v20  ;;  %v718_v33 = vadd.f32 %v2432_v55, %v2268_v45  ;;  %v693_v53 = vpop.f32.mrb[11].mxu0 }
 0x2c0   :  { %v914_v32 = vadd.f32 %v889_v43, %v715_v40  ;;  %v716_v25 = vadd.f32 %v2268_v45, %v693_v53 }
 0x2c1   :  { %v2278_v61 = vmul.f32 -1.442695, %v916_v4  ;;  %v917_v28 = vadd.f32 %v901_v31, %v718_v33 }
 0x2c2   :  { %v2276_v59 = vmul.f32 -1.442695, %v914_v32  ;;  %v915_v2 = vadd.f32 %v893_v56, %v716_v25 }
 0x2c3   :  { %2561 = vpow2.f32 %v2278_v61  ;;  %v2279_v39 = vmul.f32 -1.442695, %v917_v28 }
 0x2c4   :  { %2563 = vpow2.f32 %v2276_v59  ;;  %v2277_v41 = vmul.f32 -1.442695, %v915_v2  ;;  %v1337_v36 = vpop.f32.mrb[12].mxu0 }
 0x2c5   :  { %v2554_v26 = vpop.eup %2553  ;;  %2565 = vpow2.f32 %v2279_v39  ;;  %v1454_v48 = vadd.f32 %v3463_v0, %v1337_v36  ;;  %v1455_v18 = vadd.f32 %v3467_v51, %v1337_v36  ;;  %v2447_v9 = vpop.f32.mrb[13].mxu0  ;;  %v1452_v45 = vadd.f32 %v3465_v49, %v1337_v36 }
 0x2c6   :  { %v2556_v54 = vpop.eup %2555  ;;  %v944_v62 = vadd.f32 1.0, %v2554_v26  ;;  %2567 = vpow2.f32 %v2277_v41  ;;  %v1340_v13 = vpop.f32.mrb[14].mxu0  ;;  %v1453_v58 = vadd.f32 %v3469_v21, %v1337_v36  ;;  %v1456_v6 = vadd.f32 %v3473_v29, %v1337_v36 }
 0x2c7   :  { %v2558_v7 = vpop.eup %2557  ;;  %v942_v52 = vadd.f32 1.0, %v2556_v54  ;;  %2569 = vtanh.f32 %v1454_v48  ;;  %v2448_v8 = vpop.f32.mrb[15].mxu0  ;;  %v1457_v5 = vadd.f32 %v3477_v30, %v1337_v36  ;;  %v1458_v0 = vadd.f32 %v3471_v11, %v1337_v36  ;;  %v2280_v11 = vld [vmem:[%s3736_s7] ss:$0 sm:$0xff] }
 0x2c8   :  { %v2560_v51 = vpop.eup %2559  ;;  %2571 = vrcp.f32 %v944_v62  ;;  %v945_v63 = vadd.f32 1.0, %v2558_v7  ;;  %v1459_v49 = vadd.f32 %v3475_v17, %v1337_v36  ;;  %v2998_v13 = vmov 0  }
 0x2c9   :  { %2573 = vrcp.f32 %v942_v52  ;;  %v943_v44 = vadd.f32 1.0, %v2560_v51  ;;  %2504 = vset.pattern.permute.xlu1 %v2998_v13  ;;  %2503 = vset.pattern.permute.xlu0 %v2998_v13 }
 0x2ca   :  { %2575 = vrcp.f32 %v945_v63 }
 0x2cb   :  { %2577 = vrcp.f32 %v943_v44 }
 0x2cc   :  { %2579 = vtanh.f32 %v1455_v18 }
 0x2cd   :  { %v2562_v21 = vpop.eup %2561  ;;  %2581 = vtanh.f32 %v1452_v45 }
 0x2ce   :  { %v2564_v29 = vpop.eup %2563  ;;  %v948_v46 = vadd.f32 1.0, %v2562_v21  ;;  %2583 = vtanh.f32 %v1453_v58  ;;  %v3520_v58 = vpop.permute.xlu1 %1010 }
 0x2cf   :  { %v2566_v15 = vpop.eup %2565  ;;  %v946_v12 = vadd.f32 1.0, %v2564_v29 }
 0x2d0   :  { %v2568_v30 = vpop.eup %2567  ;;  %2585 = vrcp.f32 %v948_v46  ;;  %v949_v23 = vadd.f32 1.0, %v2566_v15 }
 0x2d1   :  { %v2570_v16 = vpop.eup %2569  ;;  %2587 = vtanh.f32 %v1456_v6  ;;  %v947_v43 = vadd.f32 1.0, %v2568_v30 }
 0x2d2   :  { %v2572_v17 = vpop.eup %2571  ;;  %2589 = vrcp.f32 %v946_v12  ;;  %v3522_v6 = vpop.permute.xlu1 %1024 }
 0x2d3   :  { %v2574_v1 = vpop.eup %2573  ;;  %v974_v19 = vmul.f32 %v2572_v17, %v2280_v11  ;;  %2591 = vtanh.f32 %v1457_v5  ;;  %v1741_v17 = vcombine.high %v3484_v38, %v3484_v38 }
 0x2d4   :  { %v2576_v42 = vpop.eup %2575  ;;  %v972_v27 = vmul.f32 %v2574_v1, %v2280_v11  ;;  %2593 = vtanh.f32 %v1458_v0  ;;  %v3528_v0 = vpop.permute.xlu0 %1017 }
 0x2d5   :  { %v2578_v3 = vpop.eup %2577  ;;  %v986_v50 = vsel %vm314_vm2, %v974_v19, 0.0  ;;  %v975_v47 = vmul.f32 %v2576_v42, %v2280_v11  ;;  %2595 = vtanh.f32 %v1459_v49 }
 0x2d6   :  { %v2580_v24 = vpop.eup %2579  ;;  %987 = vadd.xlane.f32.xlu1 %v986_v50  ;;  %v980_v20 = vsel %vm314_vm2, %v972_v27, 0.0  ;;  %2597 = vrcp.f32 %v949_v23  ;;  %v973_v33 = vmul.f32 %v2578_v3, %v2280_v11  ;;  %v3524_v7 = vpop.permute.xlu1 %1031  ;;  %v1746_v3 = vrot.slane %v3480_v60, %v3285_v14 }
 0x2d7   :  { %v2582_v22 = vpop.eup %2581  ;;  %v2346_v57 = vpack.c.bf16 %v2580_v24, %v2570_v16  ;;  %981 = vadd.xlane.f32.xlu0 %v980_v20  ;;  %v989_v4 = vsel %vm314_vm2, %v975_v47, 0.0  ;;  %2599 = vrcp.f32 %v947_v43  ;;  %v2304_v16 = vld [vmem:[%s3744_s15] ss:$0 sm:$0xff]  ;;  %v1758_v20 = vrot.slane %v1741_v17, %v3285_v14  ;;  %s2999_s15 = smov [#allocation22]  }
 0x2d8   :  { %v2584_v40 = vpop.eup %2583  ;;  %v983_v25 = vsel %vm314_vm2, %v973_v33, 0.0  ;;  %v3535_v29 = vpop.permute.xlu0 %1038  ;;  %v1750_v43 = vrot.slane %v3484_v38, %v3285_v14  ;;  %v1740_v33 = vcombine.high %v3482_v35, %v3482_v35  ;;  %s2216_s22 = sshll.u32 %s2999_s15, 4  ;;  %s2217_s22 = int_to_ptr.vmem [resolvable:$true] %s2216_s22 }
 0x2d9   :  { %v2345_v55 = vpack.c.bf16 %v2584_v40, %v2582_v22  ;;  %s2917_s2 = scalar_lea.vmem %s2217_s22, 64  ;;  %p2922_p13 = scmp.lt.s32.totalorder %s2217_s22, %s2217_s22 }
 0x2da   :  { %v2586_v31 = vpop.eup %2585  ;;  %990 = vadd.xlane.f32.xlu1 %v989_v4  ;;  %v3526_v52 = vpop.permute.xlu1 %1045  ;;  %p2918_p12 = scmp.ne.s32.totalorder %s2217_s22, %s2917_s2  ;;  %p2923_p0 = scmp.lt.s32.totalorder %s2917_s2, %s2917_s2 }
 0x2db   :  { %2465 = vmatprep.mubr.msk.bf16.mxu0 %vm314_vm2, %v2345_v55  ;;  %v2588_v53 = vpop.eup %2587  ;;  %v978_v56 = vmul.f32 %v2586_v31, %v2280_v11 }
 0x2dc   :  { %2466 = vmatmul.mubr.msk.bf16.vlgmr.msra.gmra.mrb[16].mxu0 %vm314_vm2, %v2346_v57  ;;  %v2590_v32 = vpop.eup %2589  ;;  %p2924_p1 = por %p2923_p0, %p2922_p13 }
 0x2dd   :  { %v2592_v61 = vpop.eup %2591  ;;  %v998_v41 = vsel %vm314_vm2, %v978_v56, 0.0  ;;  %v976_v36 = vmul.f32 %v2590_v32, %v2280_v11  ;;  %v1742_v32 = vcombine.high %v3486_v10, %v3486_v10 }
 0x2de   :  { %984 = vadd.xlane.f32.xlu1 %v983_v25  ;;  %v2594_v28 = vpop.eup %2593  ;;  %v2347_v59 = vpack.c.bf16 %v2592_v61, %v2588_v53  ;;  %p2925_p2 = pnand %p2924_p1, %p2918_p12 }
 0x2df   :  { %v2596_v2 = vpop.eup %2595  ;;  %v992_v48 = vsel %vm314_vm2, %v976_v36, 0.0 }
 0x2e0   :  { %2469 = vmatprep.mubr.msk.bf16.mxu0 %vm314_vm2, %v2347_v59  ;;  %v2348_v39 = vpack.c.bf16 %v2596_v2, %v2594_v28  ;;  %v2598_v26 = vpop.eup %2597  ;;  %v1770_v28 = vrot.slane %v1740_v33, %v3285_v14  ;;  %v1762_v2 = vrot.slane %v3482_v35, %v3285_v14 }
 0x2e1   :  { %v979_v18 = vmul.f32 %v2598_v26, %v2280_v11  ;;  %v2600_v9 = vpop.eup %2599  ;;  %v1774_v26 = vrot.slane %v1742_v32, %v3285_v14 }
 0x2e2   :  { %999 = vadd.xlane.f32.xlu1 %v998_v41  ;;  %v977_v54 = vmul.f32 %v2600_v9, %v2280_v11  ;;  %v1739_v11 = vcombine.high %v3480_v60, %v3480_v60 }
 0x2e3   :  { %v1001_v45 = vsel %vm314_vm2, %v979_v18, 0.0 }
 0x2e4   :  { %2470 = vmatmul.mubr.msk.bf16.gmra.mrb[20].mxu0 %vm314_vm2, %v2348_v39  ;;  %v995_v62 = vsel %vm314_vm2, %v977_v54, 0.0  ;;  %v1754_v42 = vrot.slane %v1739_v11, %v3285_v14  ;;  %v2316_v11 = vld [vmem:[#allocation19] ss:$0 sm:$0xff] }
 0x2e6   :  { %993 = vadd.xlane.f32.xlu1 %v992_v48 }
 0x2ea   :  { %1002 = vadd.xlane.f32.xlu1 %v1001_v45  ;;  %v1766_v45 = vrot.slane %v3486_v10, %v3285_v14 }
 0x2ee   :  { %996 = vadd.xlane.f32.xlu1 %v995_v62 }
 0x2ff   :  { %1059 = vbcast.lane.b32.xlu1 %v3319_v37, 256 }
 0x363   :  { %v988_v8 = vpop.xlane.xlu1 %987 }
 0x364   :  { %v1071_v37 = vmul.f32 %v3522_v6, %v988_v8 }
 0x367   :  { %v991_v5 = vpop.xlane.xlu1 %990 }
 0x368   :  { %v1072_v21 = vmul.f32 %v3524_v7, %v991_v5 }
 0x36b   :  { %v985_v51 = vpop.xlane.xlu1 %984 }
 0x36c   :  { %v1070_v63 = vmul.f32 %v3528_v0, %v985_v51 }
 0x36e   :  { %1084 = vperm.xlu1 %2504, %v1070_v63  }
 0x36f   :  { %v3531_v49 = vpop.xlane.xlu1 %999 }
 0x372   :  { %1089 = vperm.xlu1 %2504, %v1071_v37  }
 0x373   :  { %v994_v44 = vpop.xlane.xlu1 %993 }
 0x374   :  { %v1073_v15 = vmul.f32 %v3535_v29, %v994_v44 }
 0x376   :  { %1094 = vperm.xlu1 %2504, %v1072_v21  }
 0x377   :  { %v3537_v46 = vpop.xlane.xlu1 %1002 }
 0x37a   :  { %1099 = vperm.xlu1 %2504, %v1073_v15  }
 0x37b   :  { %v997_v12 = vpop.xlane.xlu1 %996 }
 0x37c   :  { %v1074_v30 = vmul.f32 %v3526_v52, %v997_v12 }
 0x37e   :  { %1104 = vperm.xlu1 %2504, %v1074_v30  }
 0x3af   :  { %v2467_v1 = vpop.f32.mrb[16].mxu0 }
 0x3b0   :  { %v1593_v19 = vadd.f32 %v2467_v1, %v2304_v16  ;;  %v1554_v23 = vpop.f32.mrb[17].mxu0 }
 0x3b1   :  { %v1591_v27 = vadd.f32 %v2304_v16, %v1554_v23  ;;  %v2468_v50 = vpop.f32.mrb[18].mxu0 }
 0x3b2   :  { %v1785_v47 = vadd.f32 %v1754_v42, %v1593_v19  ;;  %v1594_v24 = vadd.f32 %v2468_v50, %v2304_v16  ;;  %v1557_v22 = vpop.f32.mrb[19].mxu0 }
 0x3b3   :  { %v1783_v57 = vadd.f32 %v1746_v3, %v1591_v27  ;;  %v1592_v40 = vadd.f32 %v2304_v16, %v1557_v22 }
 0x3b4   :  { %v2310_v55 = vmul.f32 -1.442695, %v1785_v47  ;;  %v1786_v4 = vadd.f32 %v1758_v20, %v1594_v24 }
 0x3b5   :  { %v2308_v31 = vmul.f32 -1.442695, %v1783_v57  ;;  %v1784_v53 = vadd.f32 %v1750_v43, %v1592_v40 }
 0x3b6   :  { %2601 = vpow2.f32 %v2310_v55  ;;  %v2311_v60 = vmul.f32 -1.442695, %v1786_v4 }
 0x3b7   :  { %2603 = vpow2.f32 %v2308_v31  ;;  %v2309_v25 = vmul.f32 -1.442695, %v1784_v53  ;;  %v2471_v56 = vpop.f32.mrb[20].mxu0 }
 0x3b8   :  { %2605 = vpow2.f32 %v2311_v60  ;;  %v1597_v61 = vadd.f32 %v2471_v56, %v2304_v16  ;;  %v1570_v38 = vpop.f32.mrb[21].mxu0 }
 0x3b9   :  { %v1595_v59 = vadd.f32 %v2304_v16, %v1570_v38  ;;  %v2472_v39 = vpop.f32.mrb[22].mxu0  ;;  %2607 = vpow2.f32 %v2309_v25 }
 0x3ba   :  { %v1789_v41 = vadd.f32 %v1770_v28, %v1597_v61  ;;  %v1598_v36 = vadd.f32 %v2472_v39, %v2304_v16  ;;  %v1573_v48 = vpop.f32.mrb[23].mxu0  ;;  %v982_v39 = vpop.xlane.xlu0 %981 }
 0x3bb   :  { %v1787_v18 = vadd.f32 %v1762_v2, %v1595_v59  ;;  %v1596_v9 = vadd.f32 %v2304_v16, %v1573_v48 }
 0x3bc   :  { %v2314_v54 = vmul.f32 -1.442695, %v1789_v41  ;;  %v1790_v62 = vadd.f32 %v1774_v26, %v1598_v36  ;;  %v1069_v41 = vmul.f32 %v3520_v58, %v982_v39 }
 0x3bd   :  { %v1788_v13 = vadd.f32 %v1766_v45, %v1596_v9  ;;  %v2312_v8 = vmul.f32 -1.442695, %v1787_v18 }
 0x3be   :  { %2609 = vpow2.f32 %v2314_v54  ;;  %v2315_v44 = vmul.f32 -1.442695, %v1790_v62 }
 0x3bf   :  { %2611 = vpow2.f32 %v2312_v8  ;;  %v2313_v12 = vmul.f32 -1.442695, %v1788_v13 }
 0x3c0   :  { %v2602_v5 = vpop.eup %2601 }
 0x3c1   :  { %v2604_v51 = vpop.eup %2603  ;;  %v1817_v35 = vadd.f32 1.0, %v2602_v5 }
 0x3c2   :  { %v2606_v63 = vpop.eup %2605  ;;  %v1815_v37 = vadd.f32 1.0, %v2604_v51 }
 0x3c3   :  { %2613 = vrcp.f32 %v1817_v35  ;;  %v1818_v21 = vadd.f32 1.0, %v2606_v63  ;;  %v2608_v15 = vpop.eup %2607  ;;  %v1060_v63 = vpop.permute.xlu1 %1059 }
 0x3c4   :  { %2615 = vrcp.f32 %v1815_v37  ;;  %v1816_v14 = vadd.f32 1.0, %v2608_v15 }
 0x3c5   :  { %2617 = vpow2.f32 %v2315_v44 }
 0x3c6   :  { %2619 = vrcp.f32 %v1818_v21 }
 0x3c7   :  { %2621 = vpow2.f32 %v2313_v12 }
 0x3c8   :  { %v2610_v10 = vpop.eup %2609  ;;  %2623 = vrcp.f32 %v1816_v14 }
 0x3c9   :  { %v1821_v30 = vadd.f32 1.0, %v2610_v10  ;;  %v2612_v16 = vpop.eup %2611  ;;  %v2638_v10 = vld [vmem:[#allocation2] sm:$0xff] }
 0x3ca   :  { %v1819_v42 = vadd.f32 1.0, %v2612_v16 }
 0x3cb   :  { %2625 = vrcp.f32 %v1821_v30 }
 0x3cc   :  { %2627 = vrcp.f32 %v1819_v42 }
 0x3cd   :  { %v2614_v17 = vpop.eup %2613 }
 0x3ce   :  { %v2616_v1 = vpop.eup %2615  ;;  %v1847_v19 = vmul.f32 %v2614_v17, %v2316_v11  ;;  %v2640_v17 = vld [vmem:[#allocation2 + $0x18] sm:$0xff] }
 0x3cf   :  { %v2618_v23 = vpop.eup %2617  ;;  %v1845_v3 = vmul.f32 %v2616_v1, %v2316_v11 }
 0x3d0   :  { %v1859_v27 = vsel %vm314_vm2, %v1847_v19, 0.0  ;;  %v2620_v50 = vpop.eup %2619  ;;  %v1822_v47 = vadd.f32 1.0, %v2618_v23 }
 0x3d1   :  { %1860 = vadd.xlane.f32.xlu0 %v1859_v27  ;;  %v2622_v24 = vpop.eup %2621  ;;  %v1853_v20 = vsel %vm314_vm2, %v1845_v3, 0.0  ;;  %v1848_v22 = vmul.f32 %v2620_v50, %v2316_v11  ;;  %v2641_v50 = vld [vmem:[#allocation2 + $0x20] sm:$0xff] }
 0x3d2   :  { %v2624_v57 = vpop.eup %2623  ;;  %2629 = vrcp.f32 %v1822_v47  ;;  %v1820_v40 = vadd.f32 1.0, %v2622_v24 }
 0x3d3   :  { %v1862_v43 = vsel %vm314_vm2, %v1848_v22, 0.0  ;;  %v1846_v55 = vmul.f32 %v2624_v57, %v2316_v11 }
 0x3d4   :  { %2631 = vrcp.f32 %v1820_v40 }
 0x3d5   :  { %1854 = vadd.xlane.f32.xlu0 %v1853_v20  ;;  %v2626_v4 = vpop.eup %2625  ;;  %v1856_v33 = vsel %vm314_vm2, %v1846_v55, 0.0 }
 0x3d6   :  { %v1851_v31 = vmul.f32 %v2626_v4, %v2316_v11  ;;  %v2628_v53 = vpop.eup %2627 }
 0x3d7   :  { %v1849_v32 = vmul.f32 %v2628_v53, %v2316_v11 }
 0x3d8   :  { %v1871_v60 = vsel %vm314_vm2, %v1851_v31, 0.0  ;;  %v2642_v31 = vld [vmem:[#allocation2 + $0x28] sm:$0xff] }
 0x3d9   :  { %1863 = vadd.xlane.f32.xlu0 %v1862_v43  ;;  %v1865_v56 = vsel %vm314_vm2, %v1849_v32, 0.0 }
 0x3dc   :  { %v2630_v25 = vpop.eup %2629 }
 0x3dd   :  { %1857 = vadd.xlane.f32.xlu0 %v1856_v33  ;;  %v1852_v61 = vmul.f32 %v2630_v25, %v2316_v11  ;;  %v2643_v25 = vld [vmem:[#allocation5 + $0x8] sm:$0xff] }
 0x3de   :  { %v2632_v28 = vpop.eup %2631 }
 0x3df   :  { %v1874_v38 = vsel %vm314_vm2, %v1852_v61, 0.0  ;;  %v1850_v59 = vmul.f32 %v2632_v28, %v2316_v11  ;;  %v2639_v11 = vld [vmem:[#allocation2 + $0x10] sm:$0xff] }
 0x3e1   :  { %1872 = vadd.xlane.f32.xlu0 %v1871_v60  ;;  %v1868_v2 = vsel %vm314_vm2, %v1850_v59, 0.0  ;;  %v2644_v59 = vld [vmem:[#allocation5] sm:$0xff] }
 0x3e5   :  { %1866 = vadd.xlane.f32.xlu0 %v1865_v56 }
 0x3e9   :  { %1875 = vadd.xlane.f32.xlu0 %v1874_v38 }
 0x3ed   :  { %1869 = vadd.xlane.f32.xlu0 %v1868_v2  ;;  %v1085_v44 = vpop.permute.xlu1 %1084 }
 0x3f1   :  { %v1090_v21 = vpop.permute.xlu1 %1089 }
 0x3f2   :  { %v1119_v16 = vmul.f32 %v2639_v11, %v1090_v21 }
 0x3f4   :  { %v1139_v42 = vsel %vm314_vm2, %v1119_v16, 0.0 }
 0x3f5   :  { %v1095_v15 = vpop.permute.xlu1 %1094  ;;  %v1140_v20 = vrot.slane %v1139_v42, 4 }
 0x3f7   :  { %v1141_v33 = vadd.f32 %v1140_v20, %v1139_v42 }
 0x3f9   :  { %v1100_v1 = vpop.permute.xlu1 %1099  ;;  %v1142_v39 = vrot.slane %v1141_v33, 2 }
 0x3fa   :  { %v1121_v47 = vmul.f32 %v2641_v50, %v1100_v1 }
 0x3fc   :  { %v1153_v55 = vsel %vm314_vm2, %v1121_v47, 0.0  ;;  %v2648_v47 = vld [vmem:[#allocation2 + $0x30] sm:$0xff] }
 0x3fd   :  { %v1105_v22 = vpop.permute.xlu1 %1104  ;;  %v1154_v61 = vrot.slane %v1153_v55, 4 }
 0x3fe   :  { %v1122_v53 = vmul.f32 %v2642_v31, %v1105_v22 }
 0x403   :  { %1052 = vbcast.lane.b32.xlu0 %v3315_v34, 256 }
 0x407   :  { %1079 = vperm.xlu0 %2503, %v1069_v41   ;;  %v1160_v41 = vsel %vm314_vm2, %v1122_v53, 0.0 }
 0x45e   :  { %v1861_v36 = vpop.xlane.xlu0 %1860 }
 0x45f   :  { %v1879_v26 = vmul.f32 %v1861_v36, %v3522_v6 }
 0x461   :  { %1897 = vperm.xlu0 %2503, %v1879_v26  }
 0x462   :  { %v1855_v48 = vpop.xlane.xlu0 %1854 }
 0x463   :  { %v1877_v18 = vmul.f32 %v1855_v48, %v3520_v58  ;;  %v1076_v58 = vmul.f32 %v1060_v63, %v3537_v46  ;;  %v1155_v48 = vadd.f32 %v1154_v61, %v1153_v55 }
 0x465   :  { %1887 = vperm.xlu1 %2504, %v1877_v18   ;;  %v2645_v18 = vld [vmem:[#allocation5 + $0x10] sm:$0xff] }
 0x466   :  { %v1864_v9 = vpop.xlane.xlu0 %1863 }
 0x467   :  { %v1880_v45 = vmul.f32 %v1864_v9, %v3524_v7 }
 0x469   :  { %1902 = vperm.xlu0 %2503, %v1880_v45  }
 0x46a   :  { %v1858_v54 = vpop.xlane.xlu0 %1857 }
 0x46b   :  { %v1878_v62 = vmul.f32 %v1858_v54, %v3528_v0  ;;  %v1161_v54 = vrot.slane %v1160_v41, 4 }
 0x46d   :  { %1892 = vperm.xlu0 %2503, %v1878_v62  }
 0x46e   :  { %v1873_v34 = vpop.xlane.xlu0 %1872 }
 0x472   :  { %v1867_v13 = vpop.xlane.xlu0 %1866 }
 0x473   :  { %v1881_v7 = vmul.f32 %v1867_v13, %v3535_v29  ;;  %v1120_v29 = vmul.f32 %v2640_v17, %v1095_v15  ;;  %v1143_v13 = vadd.f32 %v1142_v39, %v1141_v33 }
 0x475   :  { %v1146_v27 = vsel %vm314_vm2, %v1120_v29, 0.0 }
 0x476   :  { %v1876_v8 = vpop.xlane.xlu0 %1875  ;;  %v1147_v57 = vrot.slane %v1146_v27, 4 }
 0x477   :  { %v1884_v37 = vmul.f32 %v1876_v8, %v1060_v63  ;;  %v2646_v8 = vld [vmem:[#allocation5 + $0x18] sm:$0xff] }
 0x478   :  { %v1148_v32 = vadd.f32 %v1147_v57, %v1146_v27 }
 0x47a   :  { %v1870_v5 = vpop.xlane.xlu0 %1869  ;;  %v1149_v36 = vrot.slane %v1148_v32, 2 }
 0x47b   :  { %v1882_v0 = vmul.f32 %v1870_v5, %v3526_v52 }
 0x47e   :  { %v1053_v51 = vpop.permute.xlu0 %1052 }
 0x47f   :  { %v1075_v6 = vmul.f32 %v1053_v51, %v3531_v49  ;;  %v1883_v35 = vmul.f32 %v1873_v34, %v1053_v51  ;;  %v2637_v49 = vld [vmem:[#allocation2 + $0x8] sm:$0xff] }
 0x480   :  { %v1118_v14 = vmul.f32 %v2637_v49, %v1085_v44  ;;  %v1144_v44 = vrot.slane %v1143_v13, 1 }
 0x481   :  { %1917 = vperm.xlu0 %2503, %v1883_v35   ;;  %1109 = vperm.xlu1 %2504, %v1075_v6   ;;  %v1150_v6 = vadd.f32 %v1149_v36, %v1148_v32  ;;  %v1156_v35 = vrot.slane %v1155_v48, 2 }
 0x482   :  { %v1132_v19 = vsel %vm314_vm2, %v1118_v14, 0.0  ;;  %v3596_v17 = vadd.f32 %v1144_v44, %v1143_v13 }
 0x483   :  { %v1133_v3 = vrot.slane %v1132_v19, 4  ;;  %v1157_v14 = vadd.f32 %v1156_v35, %v1155_v48  ;;  %v2651_v35 = vld [vmem:[#allocation5 + $0x28] sm:$0xff] }
 0x485   :  { %1907 = vperm.xlu0 %2503, %v1881_v7   ;;  %1114 = vperm.xlu1 %2504, %v1076_v58   ;;  %v1134_v43 = vadd.f32 %v1133_v3, %v1132_v19  ;;  %v2647_v3 = vld [vmem:[#allocation5 + $0x30] sm:$0xff] }
 0x486   :  { %v1080_v12 = vpop.permute.xlu0 %1079 }
 0x487   :  { %v1117_v30 = vmul.f32 %v2638_v10, %v1080_v12  ;;  %v1135_v28 = vrot.slane %v1134_v43, 2  ;;  %v1151_v12 = vrot.slane %v1150_v6, 1 }
 0x489   :  { %1912 = vperm.xlu0 %2503, %v1882_v0   ;;  %v1125_v52 = vsel %vm314_vm2, %v1117_v30, 0.0  ;;  %v1136_v45 = vadd.f32 %v1135_v28, %v1134_v43  ;;  %v1162_v0 = vadd.f32 %v1161_v54, %v1160_v41  ;;  %v3598_v1 = vadd.f32 %v1151_v12, %v1150_v6 }
 0x48a   :  { %v1126_v24 = vrot.slane %v1125_v52, 4  ;;  %v1991_v43 = vmul.f32 %v3596_v17, %v3596_v17 }
 0x48b   :  { %v1137_v7 = vrot.slane %v1136_v45, 1  ;;  %v1163_v11 = vrot.slane %v1162_v0, 2  ;;  %v1992_v31 = vmul.f32 %v3598_v1, %v3598_v1 }
 0x48c   :  { %v1127_v4 = vadd.f32 %v1126_v24, %v1125_v52 }
 0x48d   :  { %1922 = vperm.xlu0 %2503, %v1884_v37   ;;  %v3592_v30 = vadd.f32 %v1137_v7, %v1136_v45  ;;  %v1164_v22 = vadd.f32 %v1163_v11, %v1162_v0 }
 0x48e   :  { %v1128_v38 = vrot.slane %v1127_v4, 2 }
 0x48f   :  { %v1990_v20 = vmul.f32 %v3592_v30, %v3592_v30  ;;  %v1165_v41 = vrot.slane %v1164_v22, 1 }
 0x490   :  { %v1129_v62 = vadd.f32 %v1128_v38, %v1127_v4  ;;  %v2649_v38 = vld [vmem:[#allocation5 + $0x20] sm:$0xff] }
 0x492   :  { %v1130_v37 = vrot.slane %v1129_v62, 1 }
 0x494   :  { %v3594_v16 = vadd.f32 %v1130_v37, %v1129_v62 }
 0x496   :  { %v1989_v57 = vmul.f32 %v3594_v16, %v3594_v16 }
 0x498   :  { %v2005_v36 = vsel %vm744_vm3, %v1990_v20, %v1989_v57 }
 0x4e0   :  { %v1898_v46 = vpop.permute.xlu0 %1897 }
 0x4e1   :  { %v1927_v9 = vmul.f32 %v2645_v18, %v1898_v46 }
 0x4e3   :  { %v1947_v63 = vsel %vm314_vm2, %v1927_v9, 0.0 }
 0x4e4   :  { %v1888_v60 = vpop.permute.xlu1 %1887  ;;  %v1948_v49 = vrot.slane %v1947_v63, 4 }
 0x4e5   :  { %v1925_v2 = vmul.f32 %v2644_v59, %v1888_v60 }
 0x4e6   :  { %v1949_v19 = vadd.f32 %v1948_v49, %v1947_v63 }
 0x4e7   :  { %v1933_v34 = vsel %vm314_vm2, %v1925_v2, 0.0  ;;  %v2650_v2 = vld [vmem:[#allocation2 + $0x38] sm:$0xff] }
 0x4e8   :  { %v1903_v23 = vpop.permute.xlu0 %1902  ;;  %v1934_v58 = vrot.slane %v1933_v34, 4  ;;  %v1950_v53 = vrot.slane %v1949_v19, 2 }
 0x4e9   :  { %v1928_v5 = vmul.f32 %v2646_v8, %v1903_v23  ;;  %v1158_v23 = vrot.slane %v1157_v14, 1 }
 0x4ea   :  { %v1935_v10 = vadd.f32 %v1934_v58, %v1933_v34  ;;  %v1951_v62 = vadd.f32 %v1950_v53, %v1949_v19  ;;  %v2006_v58 = vsel %vm747_vm4, %v1991_v43, %v2005_v36 }
 0x4eb   :  { %v1954_v21 = vsel %vm314_vm2, %v1928_v5, 0.0  ;;  %v3610_v61 = vadd.f32 %v1158_v23, %v1157_v14 }
 0x4ec   :  { %v1893_v40 = vpop.permute.xlu0 %1892  ;;  %v1955_v46 = vrot.slane %v1954_v21, 4  ;;  %v1936_v27 = vrot.slane %v1935_v10, 2  ;;  %v1952_v14 = vrot.slane %v1951_v62, 1 }
 0x4ed   :  { %v1926_v56 = vmul.f32 %v2643_v25, %v1893_v40 }
 0x4ee   :  { %v1956_v40 = vadd.f32 %v1955_v46, %v1954_v21  ;;  %v1937_v28 = vadd.f32 %v1936_v27, %v1935_v10  ;;  %v3618_v21 = vadd.f32 %v1165_v41, %v1164_v22  ;;  %v2007_v27 = vsel %vm750_vm5, %v1992_v31, %v2006_v58 }
 0x4ef   :  { %v1940_v26 = vsel %vm314_vm2, %v1926_v56, 0.0  ;;  %v3631_v43 = vadd.f32 %v1952_v14, %v1951_v62 }
 0x4f0   :  { %v1941_v51 = vrot.slane %v1940_v26, 4  ;;  %v1938_v6 = vrot.slane %v1937_v28, 1 }
 0x4f1   :  { %v2044_v36 = vmul.f32 %v3631_v43, %v3631_v43 }
 0x4f2   :  { %v1942_v15 = vadd.f32 %v1941_v51, %v1940_v26  ;;  %v1957_v26 = vrot.slane %v1956_v40, 2  ;;  %v1993_v51 = vmul.f32 %v3610_v61, %v3610_v61  ;;  %v3623_v19 = vadd.f32 %v1938_v6, %v1937_v28 }
 0x4f4   :  { %v1943_v29 = vrot.slane %v1942_v15, 2  ;;  %v1958_v7 = vadd.f32 %v1957_v26, %v1956_v40  ;;  %v2042_v31 = vmul.f32 %v3623_v19, %v3623_v19 }
 0x4f6   :  { %v1944_v55 = vadd.f32 %v1943_v29, %v1942_v15 }
 0x4f8   :  { %v1945_v18 = vrot.slane %v1944_v55, 1 }
 0x4fa   :  { %v3620_v15 = vadd.f32 %v1945_v18, %v1944_v55 }
 0x4fc   :  { %v2043_v20 = vmul.f32 %v3620_v15, %v3620_v15 }
 0x500   :  { %v1918_v52 = vpop.permute.xlu0 %1917  ;;  %v1110_v42 = vpop.permute.xlu1 %1109 }
 0x501   :  { %v1931_v50 = vmul.f32 %v2647_v3, %v1918_v52  ;;  %v1123_v24 = vmul.f32 %v2648_v47, %v1110_v42  ;;  %v2652_v42 = vld [vmem:[#allocation5 + $0x38] sm:$0xff]  ;;  %v1959_v3 = vrot.slane %v1958_v7, 1 }
 0x503   :  { %v1975_v4 = vsel %vm314_vm2, %v1931_v50, 0.0  ;;  %v1167_v33 = vsel %vm314_vm2, %v1123_v24, 0.0 }
 0x504   :  { %v1976_v60 = vrot.slane %v1975_v4, 4  ;;  %v1168_v32 = vrot.slane %v1167_v33, 4  ;;  %v1908_v25 = vpop.permute.xlu0 %1907  ;;  %v1115_v56 = vpop.permute.xlu1 %1114 }
 0x505   :  { %v1929_v59 = vmul.f32 %v2649_v38, %v1908_v25  ;;  %v1124_v39 = vmul.f32 %v2650_v2, %v1115_v56  ;;  %v1994_v25 = vmul.f32 %v3618_v21, %v3618_v21  ;;  %v2058_v2 = vsel %vm744_vm3, %v2043_v20, %v2042_v31 }
 0x506   :  { %v1169_v48 = vadd.f32 %v1168_v32, %v1167_v33  ;;  %v1977_v9 = vadd.f32 %v1976_v60, %v1975_v4  ;;  %v2008_v32 = vsel %vm753_vm6, %v1993_v51, %v2007_v27 }
 0x507   :  { %v1961_v45 = vsel %vm314_vm2, %v1929_v59, 0.0  ;;  %v1174_v54 = vsel %vm314_vm2, %v1124_v39, 0.0  ;;  %v3642_v59 = vadd.f32 %v1959_v3, %v1958_v7  ;;  %v2009_v18 = vsel %vm756_vm7, %v1994_v25, %v2008_v32 }
 0x508   :  { %v1170_v34 = vrot.slane %v1169_v48, 2  ;;  %v1962_v13 = vrot.slane %v1961_v45, 4  ;;  %v1175_v8 = vrot.slane %v1174_v54, 4  ;;  %v1913_v5 = vpop.permute.xlu0 %1912  ;;  %v1978_v12 = vrot.slane %v1977_v9, 2 }
 0x509   :  { %v1930_v63 = vmul.f32 %v2651_v35, %v1913_v5 }
 0x50a   :  { %v1171_v0 = vadd.f32 %v1170_v34, %v1169_v48  ;;  %v1963_v37 = vadd.f32 %v1962_v13, %v1961_v45  ;;  %v1176_v44 = vadd.f32 %v1175_v8, %v1174_v54  ;;  %v1979_v22 = vadd.f32 %v1978_v12, %v1977_v9 }
 0x50b   :  { %v1968_v49 = vsel %vm314_vm2, %v1930_v63, 0.0  ;;  %v2059_v13 = vsel %vm747_vm4, %v2044_v36, %v2058_v2  ;;  %v2045_v8 = vmul.f32 %v3642_v59, %v3642_v59 }
 0x50c   :  { %v1172_v10 = vrot.slane %v1171_v0, 1  ;;  %v1964_v11 = vrot.slane %v1963_v37, 2  ;;  %v1177_v46 = vrot.slane %v1176_v44, 2  ;;  %v1923_v29 = vpop.permute.xlu0 %1922  ;;  %v1969_v52 = vrot.slane %v1968_v49, 4 }
 0x50d   :  { %v1932_v23 = vmul.f32 %v2652_v42, %v1923_v29  ;;  %v1980_v39 = vrot.slane %v1979_v22, 1  ;;  %v2060_v58 = vsel %vm750_vm5, %v2045_v8, %v2059_v13 }
 0x50e   :  { %v3626_v50 = vadd.f32 %v1172_v10, %v1171_v0  ;;  %v1965_v47 = vadd.f32 %v1964_v11, %v1963_v37  ;;  %v1178_v24 = vadd.f32 %v1177_v46, %v1176_v44  ;;  %v1970_v57 = vadd.f32 %v1969_v52, %v1968_v49 }
 0x50f   :  { %v1982_v40 = vsel %vm314_vm2, %v1932_v23, 0.0  ;;  %v3655_v5 = vadd.f32 %v1980_v39, %v1979_v22 }
 0x510   :  { %v1966_v55 = vrot.slane %v1965_v47, 1  ;;  %v1179_v4 = vrot.slane %v1178_v24, 1  ;;  %v1983_v33 = vrot.slane %v1982_v40, 4  ;;  %v1971_v53 = vrot.slane %v1970_v57, 2 }
 0x511   :  { %v1995_v60 = vmul.f32 %v3626_v50, %v3626_v50  ;;  %v2048_v37 = vmul.f32 %v3655_v5, %v3655_v5 }
 0x512   :  { %v3640_v56 = vadd.f32 %v1966_v55, %v1965_v47  ;;  %v1180_v28 = vadd.f32 %v1179_v4, %v1178_v24  ;;  %v1984_v38 = vadd.f32 %v1983_v33, %v1982_v40  ;;  %v1972_v41 = vadd.f32 %v1971_v53, %v1970_v57 }
 0x513   :  { %v2010_v45 = vsel %vm759_vm8, %v1995_v60, %v2009_v18 }
 0x514   :  { %v1985_v26 = vrot.slane %v1984_v38, 2  ;;  %v1996_v48 = vmul.f32 %v1180_v28, %v1180_v28  ;;  %v1973_v9 = vrot.slane %v1972_v41, 1  ;;  %v2046_v54 = vmul.f32 %v3640_v56, %v3640_v56 }
 0x516   :  { %v1986_v62 = vadd.f32 %v1985_v26, %v1984_v38  ;;  %v2011_v34 = vsel %vm762_vm9, %v1996_v48, %v2010_v45  ;;  %v3657_v51 = vadd.f32 %v1973_v9, %v1972_v41  ;;  %v2061_v0 = vsel %vm753_vm6, %v2046_v54, %v2060_v58 }
 0x517   :  { %v2013_v6 = vsel %vm314_vm2, %v2011_v34, 0.0 }
 0x518   :  { %v1987_v35 = vrot.slane %v1986_v62, 1  ;;  %2014 = vadd.xlane.f32.xlu1 %v2013_v6  ;;  %v2047_v63 = vmul.f32 %v3657_v51, %v3657_v51 }
 0x51a   :  { %v3663_v7 = vadd.f32 %v1987_v35, %v1986_v62  ;;  %v2062_v44 = vsel %vm756_vm7, %v2047_v63, %v2061_v0 }
 0x51b   :  { %v2063_v49 = vsel %vm759_vm8, %v2048_v37, %v2062_v44 }
 0x51c   :  { %v2049_v12 = vmul.f32 %v3663_v7, %v3663_v7 }
 0x51e   :  { %v2064_v14 = vsel %vm762_vm9, %v2049_v12, %v2063_v49 }
 0x51f   :  { %v2066_v10 = vsel %vm314_vm2, %v2064_v14, 0.0 }
 0x520   :  { %2067 = vadd.xlane.f32.xlu0 %v2066_v10 }
 0x5a5   :  { %v2015_v11 = vpop.xlane.xlu1 %2014 }
 0x5a6   :  { %v2016_v46 = vadd.f32 1e-12, %v2015_v11 }
 0x5a8   :  { %2633 = vrsqrt.f32 %v2016_v46 }
 0x5ad   :  { %v2068_v29 = vpop.xlane.xlu0 %2067 }
 0x5ae   :  { %v2069_v52 = vadd.f32 1e-12, %v2068_v29 }
 0x5b0   :  { %2635 = vrsqrt.f32 %v2069_v52 }
 0x5b2   :  { %v2634_v42 = vpop.eup %2633 }
 0x5b3   :  { %v2019_v23 = vrot.slane %v2634_v42, 1  ;;  %v2020_v27 = vrot.slane %v2634_v42, 2  ;;  %v2021_v3 = vrot.slane %v2634_v42, 3  ;;  %v2022_v47 = vrot.slane %v2634_v42, 4 }
 0x5b4   :  { %v2023_v24 = vrot.slane %v2634_v42, 5  ;;  %v2024_v20 = vrot.slane %v2634_v42, 6  ;;  %v2025_v22 = vrot.slane %v2634_v42, 7  ;;  %v2034_v57 = vmul.f32 %v2634_v42, %v3594_v16 }
 0x5b5   :  { %v2035_v40 = vmul.f32 %v2019_v23, %v3592_v30  ;;  %v2036_v55 = vmul.f32 %v2020_v27, %v3596_v17  ;;  %v2037_v4 = vmul.f32 %v2021_v3, %v3598_v1  ;;  %v2038_v33 = vmul.f32 %v2022_v47, %v3610_v61 }
 0x5b6   :  { %v2039_v31 = vmul.f32 %v2023_v24, %v3618_v21  ;;  %v2040_v53 = vmul.f32 %v2024_v20, %v3626_v50  ;;  %v2041_v60 = vmul.f32 %v2025_v22, %v1180_v28  ;;  %v2349_v32 = vpack.c.bf16 %v2034_v57, %v2034_v57 }
 0x5b7   :  { %v2350_v25 = vpack.c.bf16 %v2035_v40, %v2035_v40  ;;  %v2351_v38 = vpack.c.bf16 %v2036_v55, %v2036_v55  ;;  %v2352_v2 = vpack.c.bf16 %v2037_v4, %v2037_v4  ;;  %v2353_v39 = vpack.c.bf16 %v2038_v33, %v2038_v33 }
 0x5b8   :  { %v2354_v41 = vpack.c.bf16 %v2039_v31, %v2039_v31  ;;  %v2355_v16 = vpack.c.bf16 %v2040_v53, %v2040_v53  ;;  %v2356_v36 = vpack.c.bf16 %v2041_v60, %v2041_v60  ;;  %v2127_v18 = vunpack.c.l.b16 %v2349_v32 }
 0x5b9   :  { %v2128_v30 = vunpack.c.l.b16 %v2350_v25  ;;  %v2129_v26 = vunpack.c.l.b16 %v2351_v38  ;;  %v2130_v17 = vunpack.c.l.b16 %v2352_v2  ;;  %v2131_v48 = vunpack.c.l.b16 %v2353_v39 }
 0x5ba   :  { %v2636_v1 = vpop.eup %2635  ;;  %v2132_v61 = vunpack.c.l.b16 %v2354_v41  ;;  %v2133_v9 = vunpack.c.l.b16 %v2355_v16  ;;  %v2134_v21 = vunpack.c.l.b16 %v2356_v36 }
 0x5bb   :  { %v2135_v45 = vrot.slane %v2128_v30, 7  ;;  %v2137_v50 = vrot.slane %v2129_v26, 6  ;;  %v2139_v28 = vrot.slane %v2130_v17, 5  ;;  %v2141_v54 = vrot.slane %v2131_v48, 4 }
 0x5bc   :  { %v2143_v62 = vrot.slane %v2132_v61, 3  ;;  %v2145_v34 = vrot.slane %v2133_v9, 2  ;;  %v2147_v13 = vrot.slane %v2134_v21, 1  ;;  %v2072_v8 = vrot.slane %v2636_v1, 1 }
 0x5bd   :  { %v2136_v6 = vsel %vm744_vm3, %v2135_v45, %v2127_v18  ;;  %v2073_v35 = vrot.slane %v2636_v1, 2  ;;  %v2074_v63 = vrot.slane %v2636_v1, 3  ;;  %v2075_v58 = vrot.slane %v2636_v1, 4 }
 0x5be   :  { %v2138_v0 = vsel %vm747_vm4, %v2137_v50, %v2136_v6  ;;  %v2076_v37 = vrot.slane %v2636_v1, 5  ;;  %v2077_v44 = vrot.slane %v2636_v1, 6  ;;  %v2078_v12 = vrot.slane %v2636_v1, 7 }
 0x5bf   :  { %v2140_v49 = vsel %vm750_vm5, %v2139_v28, %v2138_v0  ;;  %v2087_v14 = vmul.f32 %v2636_v1, %v3623_v19  ;;  %v2088_v10 = vmul.f32 %v2072_v8, %v3620_v15  ;;  %v2089_v11 = vmul.f32 %v2073_v35, %v3631_v43 }
 0x5c0   :  { %v2142_v46 = vsel %vm753_vm6, %v2141_v54, %v2140_v49  ;;  %v2090_v29 = vmul.f32 %v2074_v63, %v3642_v59  ;;  %v2091_v52 = vmul.f32 %v2075_v58, %v3640_v56  ;;  %v2092_v42 = vmul.f32 %v2076_v37, %v3657_v51 }
 0x5c1   :  { %v2144_v23 = vsel %vm756_vm7, %v2143_v62, %v2142_v46  ;;  %v2093_v27 = vmul.f32 %v2077_v44, %v3655_v5  ;;  %v2094_v19 = vmul.f32 %v2078_v12, %v3663_v7  ;;  %v2357_v3 = vpack.c.bf16 %v2087_v14, %v2087_v14 }
 0x5c2   :  { %v2146_v15 = vsel %vm759_vm8, %v2145_v34, %v2144_v23  ;;  %v2358_v43 = vpack.c.bf16 %v2088_v10, %v2088_v10  ;;  %v2359_v47 = vpack.c.bf16 %v2089_v11, %v2089_v11  ;;  %v2360_v24 = vpack.c.bf16 %v2090_v29, %v2090_v29 }
 0x5c3   :  { %v2148_v59 = vsel %vm762_vm9, %v2147_v13, %v2146_v15  ;;  %v2361_v20 = vpack.c.bf16 %v2091_v52, %v2091_v52  ;;  %v2362_v56 = vpack.c.bf16 %v2092_v42, %v2092_v42  ;;  %v2363_v22 = vpack.c.bf16 %v2093_v27, %v2093_v27 }
 0x5c4   :  { %v2149_v51 = vpack.c.b16 %v2148_v59, %v2148_v59  ;;  %v2364_v57 = vpack.c.bf16 %v2094_v19, %v2094_v19  ;;  %v2186_v40 = vunpack.c.l.b16 %v2358_v43  ;;  %v2187_v55 = vunpack.c.l.b16 %v2359_v47 }
 0x5c5   :  { %v2188_v4 = vunpack.c.l.b16 %v2360_v24  ;;  %v2189_v5 = vunpack.c.l.b16 %v2361_v20  ;;  %v2185_v7 = vunpack.c.l.b16 %v2357_v3  ;;  %v2190_v33 = vunpack.c.l.b16 %v2362_v56 }
 0x5c6   :  { %2152 = vst.msk [vmem:[#allocation22] sm:$0xf] %vm2151_vm10, %v2149_v51  ;;  %v2193_v31 = vrot.slane %v2186_v40, 7 }
 0x5c7   :  { %2928 = shalt.err (!%p2925_p2)
}
 0x5c8   :  { %s2929_s12 = scalar_lea.hbm %s3746_s17, 64 }
 0x5c9   :  { %p2930_p3 = scmp.ne.s32.totalorder %s3746_s17, %s2929_s12  ;;  %p2933_p4 = scmp.lt.u32.totalorder %s2929_s12, %s3746_s17 }
 0x5cb   :  { %p2935_p5 = pnand %p2933_p4, %p2930_p3 }
 0x5cd   :  { %2938 = shalt.err (!%p2935_p5)
}
 0x5ce   :  { %2219 = dma.vmem_to_hbm [thread:$0]  %s2217_s22, 64, %s3746_s17, [#allocation4]   ;;  %v2191_v53 = vunpack.c.l.b16 %v2363_v22  ;;  %v2195_v60 = vrot.slane %v2187_v55, 6  ;;  %v2192_v32 = vunpack.c.l.b16 %v2364_v57  ;;  %v2194_v25 = vsel %vm744_vm3, %v2193_v31, %v2185_v7 }
 0x5cf   :  { %v2197_v38 = vrot.slane %v2188_v4, 5  ;;  %v2199_v39 = vrot.slane %v2189_v5, 4  ;;  %v2201_v16 = vrot.slane %v2190_v33, 3  ;;  %s3000_s21 = smov [#allocation23]  }
 0x5d0   :  { %v2196_v2 = vsel %vm747_vm4, %v2195_v60, %v2194_v25  ;;  %v2203_v30 = vrot.slane %v2191_v53, 2  ;;  %v2205_v17 = vrot.slane %v2192_v32, 1  ;;  %s2226_s17 = sshll.u32 %s3000_s21, 4  ;;  %s2227_s17 = int_to_ptr.vmem [resolvable:$true] %s2226_s17 }
 0x5d1   :  { %v2198_v41 = vsel %vm750_vm5, %v2197_v38, %v2196_v2  ;;  %s2939_s16 = scalar_lea.vmem %s2227_s17, 64  ;;  %p2944_p7 = scmp.lt.s32.totalorder %s2227_s17, %s2227_s17 }
 0x5d2   :  { %v2200_v36 = vsel %vm753_vm6, %v2199_v39, %v2198_v41  ;;  %p2940_p6 = scmp.ne.s32.totalorder %s2227_s17, %s2939_s16  ;;  %p2945_p8 = scmp.lt.s32.totalorder %s2939_s16, %s2939_s16 }
 0x5d3   :  { %v2202_v26 = vsel %vm756_vm7, %v2201_v16, %v2200_v36 }
 0x5d4   :  { %v2204_v48 = vsel %vm759_vm8, %v2203_v30, %v2202_v26  ;;  %p2946_p9 = por %p2945_p8, %p2944_p7 }
 0x5d5   :  { %v2206_v1 = vsel %vm762_vm9, %v2205_v17, %v2204_v48 }
 0x5d6   :  { %v2207_v18 = vpack.c.b16 %v2206_v1, %v2206_v1  ;;  %p2947_p10 = pnand %p2946_p9, %p2940_p6 }
 0x5d8   :  { %2209 = vst.msk [vmem:[#allocation23] sm:$0xf] %vm2151_vm10, %v2207_v18 }
 0x5d9   :  { %2950 = shalt.err (!%p2947_p10)
}
 0x5da   :  { %s2951_s29 = scalar_lea.hbm %s3747_s18, 64 }
 0x5db   :  { %p2952_p11 = scmp.ne.s32.totalorder %s3747_s18, %s2951_s29  ;;  %p2955_p12 = scmp.lt.u32.totalorder %s2951_s29, %s3747_s18 }
 0x5dd   :  { %p2957_p13 = pnand %p2955_p12, %p2952_p11 }
 0x5df   :  { %2960 = shalt.err (!%p2957_p13)
}
 0x5e0   :  { %2229 = dma.vmem_to_hbm [thread:$0]  %s2227_s17, 64, %s3747_s18, [#allocation24]  }
 0x5e1   :  { %2975 = dma.done.wait [#allocation4], 64  }
 0x5e2   :  { %2976 = vsyncadd [#allocation4], 4294967232 }
 0x5e3   :  { %2977 = dma.done.wait [#allocation24], 64  }
 0x5e4   :  { %2978 = vsyncadd [#allocation24], 4294967232 }
 0x5e5   :  { %2236 = vsyncpa [#allocation3], 1 }
 0x5e6   :  { %2237 = vsyncpa [#allocation6], 1 }
 0x5e7   :  { %2238 = vsyncpa [#allocation9], 1 }
 0x5e8   :  { %2239 = vsyncpa [#allocation12], 1 }
 0x5e9   :  { %2240 = vsyncpa [#allocation15], 1 }
 0x5ea   :  { %2241 = vsyncpa [#allocation18], 1 }
 0x5eb   :  { %2242 = vsyncpa [#allocation21], 1 }
 0x5ec   :  { %2243 = vsyncpa [#allocation4], 1 }
 0x5ed   :  { %2244 = vsyncpa [#allocation24], 1 }

</bundles_post_ra>
